<compile_context>
chip_gen: v5e
topology: v5e:2x2
jax: 0.10.0
libtpu: 0.0.40
codegen_flags: <defaults>
</compile_context>

<pallas_src>
import jax
import jax.numpy as jnp
import numpy as np
from jax import lax
from jax.experimental import pallas as pl
from jax.experimental.pallas import tpu as pltpu


def _sparse_kernel3d_kernel(xb_ref, wtoe_ref, bconv_ref, wlo_ref, blo_ref,
                            o_ref, acc_ref):
    # xb_ref   : (1, 1, bx+2, Ny+2, K)   padded halo'd x-block, K = (T+2)*C
    # wtoe_ref : (9, K, T*C)             block-Toeplitz conv taps, tap = dx*3+dy
    # bconv_ref: (1, T*C)                conv bias tiled along T
    # wlo_ref  : (T*C, T*Co2)            block-diagonal Linear weight
    # blo_ref  : (1, T*Co2)              Linear bias tiled along T
    # o_ref    : (1, 1, bx*Ny, T*Co2)    lane-dense output block
    # acc_ref  : VMEM scratch (bx*Ny, T*C) f32
    bx = xb_ref.shape[2] - 2
    Ny = xb_ref.shape[3] - 2
    K = xb_ref.shape[4]
    rows = bx * Ny

    acc_ref[...] = jnp.zeros_like(acc_ref)
    for dx in range(3):
        for dy in range(3):
            slab = xb_ref[0, 0, dx:dx + bx, dy:dy + Ny, :]     # (bx, Ny, K)
            slab = slab.reshape(rows, K)
            acc_ref[...] += jnp.dot(slab, wtoe_ref[dx * 3 + dy],
                                    preferred_element_type=jnp.float32)

    h = jnp.maximum(acc_ref[...] + bconv_ref[0, :], 0.0)       # bias + ReLU
    out = jnp.dot(h, wlo_ref[...],
                  preferred_element_type=jnp.float32) + blo_ref[0, :]
    o_ref[0, 0, :, :] = out.astype(o_ref.dtype)


def sparse_kernel3d_forward(x, conv_w, conv_b, lo_w, lo_b, *, k, c,
                            num_x_blocks=None):
    """x: (B, Nx, Ny, T, c_in, ich) with c_in*ich == alpha*k**2."""
    B, Nx, Ny, T, cc, ich = x.shape
    C = cc * ich                    # alpha * k**2 (conv channels)
    Co2 = c * k * k                 # Linear output features
    assert conv_w.shape == (C, C, 3, 3, 3)
    assert lo_w.shape == (Co2, C)

    if num_x_blocks is None:
        num_x_blocks = 2 if (Nx % 2 == 0 and Nx >= 2) else 1
    assert Nx % num_x_blocks == 0
    bx = Nx // num_x_blocks
    K = (T + 2) * C                 # conv contraction width
    Nc = T * C                      # conv output width per (x,y) row
    No = T * Co2                    # Linear output width per (x,y) row (lanes)
    rows = bx * Ny

    # ---- input prep: pad spatial dims, flatten (T+2, C) -> K, split Nx into
    #      halo'd blocks (grid axis 1). ----
    xf = x.reshape(B, Nx, Ny, T, C)
    xp = jnp.pad(xf, ((0, 0), (1, 1), (1, 1), (1, 1), (0, 0)))
    xp = xp.reshape(B, Nx + 2, Ny + 2, K)
    xb = jnp.stack([xp[:, i * bx:i * bx + bx + 2]
                    for i in range(num_x_blocks)], axis=1)
    # xb: (B, num_x_blocks, bx+2, Ny+2, K)

    # ---- conv weights -> 9 block-Toeplitz (K, T*C) matrices, tap = dx*3+dy:
    #      W[tap][(t_in*C + ci), (t_out*C + co)] = conv_w[co, ci, dx, dy, t_in - t_out]
    wt = jnp.transpose(conv_w, (2, 3, 4, 1, 0))                # (3,3,3,Cin,Cout)
    sel = jnp.stack([jnp.eye(T + 2, T, k=-dt, dtype=conv_w.dtype)
                     for dt in range(3)])                      # (3, T+2, T)
    wtoe = jnp.einsum('dij,xydco->xyicjo', sel, wt).reshape(9, K, Nc)
    bconv = jnp.tile(conv_b, T).reshape(1, Nc)

    # ---- Linear as a block-diagonal (T*C, T*Co2) matmul in the same layout.
    wlo_bd = jnp.kron(jnp.eye(T, dtype=lo_w.dtype), lo_w.T)    # (T*C, T*Co2)
    blo = jnp.tile(lo_b, T).reshape(1, No)

    out = pl.pallas_call(
        _sparse_kernel3d_kernel,
        out_shape=jax.ShapeDtypeStruct((B, num_x_blocks, rows, No), x.dtype),
        grid_spec=pltpu.PrefetchScalarGridSpec(
            num_scalar_prefetch=0,
            grid=(B, num_x_blocks),
            in_specs=[
                pl.BlockSpec((1, 1, bx + 2, Ny + 2, K),
                             lambda b, i: (b, i, 0, 0, 0)),
                pl.BlockSpec((9, K, Nc), lambda b, i: (0, 0, 0)),
                pl.BlockSpec((1, Nc), lambda b, i: (0, 0)),
                pl.BlockSpec((Nc, No), lambda b, i: (0, 0)),
                pl.BlockSpec((1, No), lambda b, i: (0, 0)),
            ],
            out_specs=pl.BlockSpec((1, 1, rows, No),
                                   lambda b, i: (b, i, 0, 0)),
            scratch_shapes=[pltpu.VMEM((rows, Nc), jnp.float32)],
        ),
        compiler_params=pltpu.CompilerParams(
            dimension_semantics=("parallel", "parallel")),
    )(xb, wtoe, bconv, wlo_bd, blo)

    # (B, nbx, bx*Ny, T*Co2) is row-major (B, Nx, Ny, T, Co2): free reshape.
    return out.reshape(B, Nx, Ny, T, c, k * k)


def sparse_kernel3d_reference(x, conv_w, conv_b, lo_w, lo_b, *, k, c):
    """Pure-JAX reference matching the PyTorch forward semantics (full f32)."""
    B, Nx, Ny, T, cc, ich = x.shape
    C = cc * ich
    xf = x.reshape(B, Nx, Ny, T, C)
    xc = jnp.transpose(xf, (0, 4, 1, 2, 3))                    # NCDHW
    y = lax.conv_general_dilated(
        xc, conv_w, window_strides=(1, 1, 1),
        padding=((1, 1), (1, 1), (1, 1)),
        dimension_numbers=("NCDHW", "OIDHW", "NCDHW"),
        precision=lax.Precision.HIGHEST)
    y = y + conv_b[None, :, None, None, None]
    y = jnp.maximum(y, 0.0)
    y = jnp.transpose(y, (0, 2, 3, 4, 1))                      # channels-last
    y = jnp.einsum("bxytc,oc->bxyto", y, lo_w,
                   precision=lax.Precision.HIGHEST) + lo_b
    return y.reshape(B, Nx, Ny, T, c, k * k)


if __name__ == "__main__":
    # Module hyperparameters (consistent: c*ich == alpha*k**2 and ich == k**2)
    k, alpha, c = 4, 2, 2
    C = alpha * k * k        # 32 conv channels
    Co2 = c * k * k          # 32 Linear output features
    ich = k * k              # 16

    B, Nx, Ny, T = 2, 8, 8, 4

    key = jax.random.PRNGKey(0)
    kx, kw1, kb1, kw2, kb2 = jax.random.split(key, 5)

    x = jax.random.normal(kx, (B, Nx, Ny, T, c, ich), dtype=jnp.float32)

    # Deterministic parameter init (PyTorch-default-style uniform bounds)
    fan_conv = C * 27
    bc = 1.0 / np.sqrt(fan_conv)
    conv_w = jax.random.uniform(kw1, (C, C, 3, 3, 3), jnp.float32, -bc, bc)
    conv_b = jax.random.uniform(kb1, (C,), jnp.float32, -bc, bc)
    bl = 1.0 / np.sqrt(C)
    lo_w = jax.random.uniform(kw2, (Co2, C), jnp.float32, -bl, bl)
    lo_b = jax.random.uniform(kb2, (Co2,), jnp.float32, -bl, bl)

    out = sparse_kernel3d_forward(x, conv_w, conv_b, lo_w, lo_b, k=k, c=c,
                                  num_x_blocks=2)
    out = jax.block_until_ready(out)

    ref = sparse_kernel3d_reference(x, conv_w, conv_b, lo_w, lo_b, k=k, c=c)
    ref = jax.block_until_ready(ref)

    assert out.shape == (B, Nx, Ny, T, c, k * k), out.shape
    # Kernel matmuls use default precision (single-pass bf16 MXU, f32
    # accumulate) per the perf review; reference is full f32, so allow ~1e-2.
    np.testing.assert_allclose(np.asarray(out), np.asarray(ref),
                               rtol=1e-2, atol=1e-2)
    print("KERNEL_OK")
</pallas_src>

<mosaic_0001>
module attributes {stable_mosaic.version = 11 : i64} {
  func.func @_sparse_kernel3d_kernel(%arg0: i32, %arg1: i32, %arg2: memref<1x1x6x10x192xf32, #tpu.memory_space<vmem>>, %arg3: memref<9x192x128xf32, #tpu.memory_space<vmem>>, %arg4: memref<1x128xf32, #tpu.memory_space<vmem>>, %arg5: memref<128x128xf32, #tpu.memory_space<vmem>>, %arg6: memref<1x128xf32, #tpu.memory_space<vmem>>, %arg7: memref<1x1x32x128xf32, #tpu.memory_space<vmem>>, %arg8: memref<32x128xf32, #tpu.memory_space<vmem>>) attributes {dimension_semantics = [#tpu.dimension_semantics<parallel>, #tpu.dimension_semantics<parallel>], iteration_bounds = array<i64: 2, 2>, scalar_prefetch = 0 : i64, scratch_operands = 1 : i64, tpu.core_type = #tpu.core_type<tc>, window_params = [{transform_indices = @transform_0, window_bounds = array<i64: 1, 1, 6, 10, 192>}, {pipeline_mode = #tpu.pipeline_mode<synchronous>, transform_indices = @transform_1, window_bounds = array<i64: 9, 192, 128>}, {pipeline_mode = #tpu.pipeline_mode<synchronous>, transform_indices = @transform_2, window_bounds = array<i64: 1, 128>}, {pipeline_mode = #tpu.pipeline_mode<synchronous>, transform_indices = @transform_3, window_bounds = array<i64: 128, 128>}, {pipeline_mode = #tpu.pipeline_mode<synchronous>, transform_indices = @transform_4, window_bounds = array<i64: 1, 128>}, {transform_indices = @transform_5, window_bounds = array<i64: 1, 1, 32, 128>}]} {
    %cst = arith.constant 0.000000e+00 : f32
    %0 = vector.broadcast %cst : f32 to vector<32x128xf32>
    %c0 = arith.constant 0 : index
    %c0_0 = arith.constant 0 : index
    %1 = vector.load %arg8[%c0, %c0_0] : memref<32x128xf32, #tpu.memory_space<vmem>>, vector<32x128xf32>
    tpu.vector_store %arg8[%c0, %c0_0], %0 {strides = array<i32>} : memref<32x128xf32, #tpu.memory_space<vmem>>, vector<32x128xf32>,
    %c0_1 = arith.constant 0 : index
    %c0_2 = arith.constant 0 : index
    %c0_3 = arith.constant 0 : index
    %c0_4 = arith.constant 0 : index
    %c0_5 = arith.constant 0 : index
    %2 = vector.load %arg2[%c0_1, %c0_2, %c0_3, %c0_4, %c0_5] : memref<1x1x6x10x192xf32, #tpu.memory_space<vmem>>, vector<1x1x4x8x192xf32>
    %3 = vector.shape_cast %2 : vector<1x1x4x8x192xf32> to vector<4x8x192xf32>
    %4 = vector.shape_cast %3 : vector<4x8x192xf32> to vector<32x192xf32>
    %c0_6 = arith.constant 0 : index
    %c0_7 = arith.constant 0 : index
    %5 = vector.load %arg8[%c0_6, %c0_7] : memref<32x128xf32, #tpu.memory_space<vmem>>, vector<32x128xf32>
    %c0_8 = arith.constant 0 : index
    %c0_9 = arith.constant 0 : index
    %c0_10 = arith.constant 0 : index
    %6 = vector.load %arg3[%c0_8, %c0_9, %c0_10] : memref<9x192x128xf32, #tpu.memory_space<vmem>>, vector<1x192x128xf32>
    %7 = vector.shape_cast %6 : vector<1x192x128xf32> to vector<192x128xf32>
    %cst_11 = arith.constant dense<0.000000e+00> : vector<32x128xf32>
    %8 = tpu.matmul %4, %7, %cst_11 {dimension_numbers = #tpu.dot_dimension_numbers<[1], [0], [0], [1], [0, 0, 1, 1], [], []>} : vector<32x192xf32>, vector<192x128xf32>, vector<32x128xf32> -> vector<32x128xf32>
    %9 = arith.addf %5, %8 : vector<32x128xf32>
    %c0_12 = arith.constant 0 : index
    %c0_13 = arith.constant 0 : index
    %10 = vector.load %arg8[%c0_12, %c0_13] : memref<32x128xf32, #tpu.memory_space<vmem>>, vector<32x128xf32>
    tpu.vector_store %arg8[%c0_12, %c0_13], %9 {strides = array<i32>} : memref<32x128xf32, #tpu.memory_space<vmem>>, vector<32x128xf32>,
    %c0_14 = arith.constant 0 : index
    %c0_15 = arith.constant 0 : index
    %c0_16 = arith.constant 0 : index
    %c1 = arith.constant 1 : index
    %c0_17 = arith.constant 0 : index
    %11 = vector.load %arg2[%c0_14, %c0_15, %c0_16, %c1, %c0_17] : memref<1x1x6x10x192xf32, #tpu.memory_space<vmem>>, vector<1x1x4x8x192xf32>
    %12 = vector.shape_cast %11 : vector<1x1x4x8x192xf32> to vector<4x8x192xf32>
    %13 = vector.shape_cast %12 : vector<4x8x192xf32> to vector<32x192xf32>
    %c0_18 = arith.constant 0 : index
    %c0_19 = arith.constant 0 : index
    %14 = vector.load %arg8[%c0_18, %c0_19] : memref<32x128xf32, #tpu.memory_space<vmem>>, vector<32x128xf32>
    %c1_20 = arith.constant 1 : index
    %c0_21 = arith.constant 0 : index
    %c0_22 = arith.constant 0 : index
    %15 = vector.load %arg3[%c1_20, %c0_21, %c0_22] : memref<9x192x128xf32, #tpu.memory_space<vmem>>, vector<1x192x128xf32>
    %16 = vector.shape_cast %15 : vector<1x192x128xf32> to vector<192x128xf32>
    %cst_23 = arith.constant dense<0.000000e+00> : vector<32x128xf32>
    %17 = tpu.matmul %13, %16, %cst_23 {dimension_numbers = #tpu.dot_dimension_numbers<[1], [0], [0], [1], [0, 0, 1, 1], [], []>} : vector<32x192xf32>, vector<192x128xf32>, vector<32x128xf32> -> vector<32x128xf32>
    %18 = arith.addf %14, %17 : vector<32x128xf32>
    %c0_24 = arith.constant 0 : index
    %c0_25 = arith.constant 0 : index
    %19 = vector.load %arg8[%c0_24, %c0_25] : memref<32x128xf32, #tpu.memory_space<vmem>>, vector<32x128xf32>
    tpu.vector_store %arg8[%c0_24, %c0_25], %18 {strides = array<i32>} : memref<32x128xf32, #tpu.memory_space<vmem>>, vector<32x128xf32>,
    %c0_26 = arith.constant 0 : index
    %c0_27 = arith.constant 0 : index
    %c0_28 = arith.constant 0 : index
    %c2 = arith.constant 2 : index
    %c0_29 = arith.constant 0 : index
    %20 = vector.load %arg2[%c0_26, %c0_27, %c0_28, %c2, %c0_29] : memref<1x1x6x10x192xf32, #tpu.memory_space<vmem>>, vector<1x1x4x8x192xf32>
    %21 = vector.shape_cast %20 : vector<1x1x4x8x192xf32> to vector<4x8x192xf32>
    %22 = vector.shape_cast %21 : vector<4x8x192xf32> to vector<32x192xf32>
    %c0_30 = arith.constant 0 : index
    %c0_31 = arith.constant 0 : index
    %23 = vector.load %arg8[%c0_30, %c0_31] : memref<32x128xf32, #tpu.memory_space<vmem>>, vector<32x128xf32>
    %c2_32 = arith.constant 2 : index
    %c0_33 = arith.constant 0 : index
    %c0_34 = arith.constant 0 : index
    %24 = vector.load %arg3[%c2_32, %c0_33, %c0_34] : memref<9x192x128xf32, #tpu.memory_space<vmem>>, vector<1x192x128xf32>
    %25 = vector.shape_cast %24 : vector<1x192x128xf32> to vector<192x128xf32>
    %cst_35 = arith.constant dense<0.000000e+00> : vector<32x128xf32>
    %26 = tpu.matmul %22, %25, %cst_35 {dimension_numbers = #tpu.dot_dimension_numbers<[1], [0], [0], [1], [0, 0, 1, 1], [], []>} : vector<32x192xf32>, vector<192x128xf32>, vector<32x128xf32> -> vector<32x128xf32>
    %27 = arith.addf %23, %26 : vector<32x128xf32>
    %c0_36 = arith.constant 0 : index
    %c0_37 = arith.constant 0 : index
    %28 = vector.load %arg8[%c0_36, %c0_37] : memref<32x128xf32, #tpu.memory_space<vmem>>, vector<32x128xf32>
    tpu.vector_store %arg8[%c0_36, %c0_37], %27 {strides = array<i32>} : memref<32x128xf32, #tpu.memory_space<vmem>>, vector<32x128xf32>,
    %c0_38 = arith.constant 0 : index
    %c0_39 = arith.constant 0 : index
    %c1_40 = arith.constant 1 : index
    %c0_41 = arith.constant 0 : index
    %c0_42 = arith.constant 0 : index
    %29 = vector.load %arg2[%c0_38, %c0_39, %c1_40, %c0_41, %c0_42] : memref<1x1x6x10x192xf32, #tpu.memory_space<vmem>>, vector<1x1x4x8x192xf32>
    %30 = vector.shape_cast %29 : vector<1x1x4x8x192xf32> to vector<4x8x192xf32>
    %31 = vector.shape_cast %30 : vector<4x8x192xf32> to vector<32x192xf32>
    %c0_43 = arith.constant 0 : index
    %c0_44 = arith.constant 0 : index
    %32 = vector.load %arg8[%c0_43, %c0_44] : memref<32x128xf32, #tpu.memory_space<vmem>>, vector<32x128xf32>
    %c3 = arith.constant 3 : index
    %c0_45 = arith.constant 0 : index
    %c0_46 = arith.constant 0 : index
    %33 = vector.load %arg3[%c3, %c0_45, %c0_46] : memref<9x192x128xf32, #tpu.memory_space<vmem>>, vector<1x192x128xf32>
    %34 = vector.shape_cast %33 : vector<1x192x128xf32> to vector<192x128xf32>
    %cst_47 = arith.constant dense<0.000000e+00> : vector<32x128xf32>
    %35 = tpu.matmul %31, %34, %cst_47 {dimension_numbers = #tpu.dot_dimension_numbers<[1], [0], [0], [1], [0, 0, 1, 1], [], []>} : vector<32x192xf32>, vector<192x128xf32>, vector<32x128xf32> -> vector<32x128xf32>
    %36 = arith.addf %32, %35 : vector<32x128xf32>
    %c0_48 = arith.constant 0 : index
    %c0_49 = arith.constant 0 : index
    %37 = vector.load %arg8[%c0_48, %c0_49] : memref<32x128xf32, #tpu.memory_space<vmem>>, vector<32x128xf32>
    tpu.vector_store %arg8[%c0_48, %c0_49], %36 {strides = array<i32>} : memref<32x128xf32, #tpu.memory_space<vmem>>, vector<32x128xf32>,
    %c0_50 = arith.constant 0 : index
    %c0_51 = arith.constant 0 : index
    %c1_52 = arith.constant 1 : index
    %c1_53 = arith.constant 1 : index
    %c0_54 = arith.constant 0 : index
    %38 = vector.load %arg2[%c0_50, %c0_51, %c1_52, %c1_53, %c0_54] : memref<1x1x6x10x192xf32, #tpu.memory_space<vmem>>, vector<1x1x4x8x192xf32>
    %39 = vector.shape_cast %38 : vector<1x1x4x8x192xf32> to vector<4x8x192xf32>
    %40 = vector.shape_cast %39 : vector<4x8x192xf32> to vector<32x192xf32>
    %c0_55 = arith.constant 0 : index
    %c0_56 = arith.constant 0 : index
    %41 = vector.load %arg8[%c0_55, %c0_56] : memref<32x128xf32, #tpu.memory_space<vmem>>, vector<32x128xf32>
    %c4 = arith.constant 4 : index
    %c0_57 = arith.constant 0 : index
    %c0_58 = arith.constant 0 : index
    %42 = vector.load %arg3[%c4, %c0_57, %c0_58] : memref<9x192x128xf32, #tpu.memory_space<vmem>>, vector<1x192x128xf32>
    %43 = vector.shape_cast %42 : vector<1x192x128xf32> to vector<192x128xf32>
    %cst_59 = arith.constant dense<0.000000e+00> : vector<32x128xf32>
    %44 = tpu.matmul %40, %43, %cst_59 {dimension_numbers = #tpu.dot_dimension_numbers<[1], [0], [0], [1], [0, 0, 1, 1], [], []>} : vector<32x192xf32>, vector<192x128xf32>, vector<32x128xf32> -> vector<32x128xf32>
    %45 = arith.addf %41, %44 : vector<32x128xf32>
    %c0_60 = arith.constant 0 : index
    %c0_61 = arith.constant 0 : index
    %46 = vector.load %arg8[%c0_60, %c0_61] : memref<32x128xf32, #tpu.memory_space<vmem>>, vector<32x128xf32>
    tpu.vector_store %arg8[%c0_60, %c0_61], %45 {strides = array<i32>} : memref<32x128xf32, #tpu.memory_space<vmem>>, vector<32x128xf32>,
    %c0_62 = arith.constant 0 : index
    %c0_63 = arith.constant 0 : index
    %c1_64 = arith.constant 1 : index
    %c2_65 = arith.constant 2 : index
    %c0_66 = arith.constant 0 : index
    %47 = vector.load %arg2[%c0_62, %c0_63, %c1_64, %c2_65, %c0_66] : memref<1x1x6x10x192xf32, #tpu.memory_space<vmem>>, vector<1x1x4x8x192xf32>
    %48 = vector.shape_cast %47 : vector<1x1x4x8x192xf32> to vector<4x8x192xf32>
    %49 = vector.shape_cast %48 : vector<4x8x192xf32> to vector<32x192xf32>
    %c0_67 = arith.constant 0 : index
    %c0_68 = arith.constant 0 : index
    %50 = vector.load %arg8[%c0_67, %c0_68] : memref<32x128xf32, #tpu.memory_space<vmem>>, vector<32x128xf32>
    %c5 = arith.constant 5 : index
    %c0_69 = arith.constant 0 : index
    %c0_70 = arith.constant 0 : index
    %51 = vector.load %arg3[%c5, %c0_69, %c0_70] : memref<9x192x128xf32, #tpu.memory_space<vmem>>, vector<1x192x128xf32>
    %52 = vector.shape_cast %51 : vector<1x192x128xf32> to vector<192x128xf32>
    %cst_71 = arith.constant dense<0.000000e+00> : vector<32x128xf32>
    %53 = tpu.matmul %49, %52, %cst_71 {dimension_numbers = #tpu.dot_dimension_numbers<[1], [0], [0], [1], [0, 0, 1, 1], [], []>} : vector<32x192xf32>, vector<192x128xf32>, vector<32x128xf32> -> vector<32x128xf32>
    %54 = arith.addf %50, %53 : vector<32x128xf32>
    %c0_72 = arith.constant 0 : index
    %c0_73 = arith.constant 0 : index
    %55 = vector.load %arg8[%c0_72, %c0_73] : memref<32x128xf32, #tpu.memory_space<vmem>>, vector<32x128xf32>
    tpu.vector_store %arg8[%c0_72, %c0_73], %54 {strides = array<i32>} : memref<32x128xf32, #tpu.memory_space<vmem>>, vector<32x128xf32>,
    %c0_74 = arith.constant 0 : index
    %c0_75 = arith.constant 0 : index
    %c2_76 = arith.constant 2 : index
    %c0_77 = arith.constant 0 : index
    %c0_78 = arith.constant 0 : index
    %56 = vector.load %arg2[%c0_74, %c0_75, %c2_76, %c0_77, %c0_78] : memref<1x1x6x10x192xf32, #tpu.memory_space<vmem>>, vector<1x1x4x8x192xf32>
    %57 = vector.shape_cast %56 : vector<1x1x4x8x192xf32> to vector<4x8x192xf32>
    %58 = vector.shape_cast %57 : vector<4x8x192xf32> to vector<32x192xf32>
    %c0_79 = arith.constant 0 : index
    %c0_80 = arith.constant 0 : index
    %59 = vector.load %arg8[%c0_79, %c0_80] : memref<32x128xf32, #tpu.memory_space<vmem>>, vector<32x128xf32>
    %c6 = arith.constant 6 : index
    %c0_81 = arith.constant 0 : index
    %c0_82 = arith.constant 0 : index
    %60 = vector.load %arg3[%c6, %c0_81, %c0_82] : memref<9x192x128xf32, #tpu.memory_space<vmem>>, vector<1x192x128xf32>
    %61 = vector.shape_cast %60 : vector<1x192x128xf32> to vector<192x128xf32>
    %cst_83 = arith.constant dense<0.000000e+00> : vector<32x128xf32>
    %62 = tpu.matmul %58, %61, %cst_83 {dimension_numbers = #tpu.dot_dimension_numbers<[1], [0], [0], [1], [0, 0, 1, 1], [], []>} : vector<32x192xf32>, vector<192x128xf32>, vector<32x128xf32> -> vector<32x128xf32>
    %63 = arith.addf %59, %62 : vector<32x128xf32>
    %c0_84 = arith.constant 0 : index
    %c0_85 = arith.constant 0 : index
    %64 = vector.load %arg8[%c0_84, %c0_85] : memref<32x128xf32, #tpu.memory_space<vmem>>, vector<32x128xf32>
    tpu.vector_store %arg8[%c0_84, %c0_85], %63 {strides = array<i32>} : memref<32x128xf32, #tpu.memory_space<vmem>>, vector<32x128xf32>,
    %c0_86 = arith.constant 0 : index
    %c0_87 = arith.constant 0 : index
    %c2_88 = arith.constant 2 : index
    %c1_89 = arith.constant 1 : index
    %c0_90 = arith.constant 0 : index
    %65 = vector.load %arg2[%c0_86, %c0_87, %c2_88, %c1_89, %c0_90] : memref<1x1x6x10x192xf32, #tpu.memory_space<vmem>>, vector<1x1x4x8x192xf32>
    %66 = vector.shape_cast %65 : vector<1x1x4x8x192xf32> to vector<4x8x192xf32>
    %67 = vector.shape_cast %66 : vector<4x8x192xf32> to vector<32x192xf32>
    %c0_91 = arith.constant 0 : index
    %c0_92 = arith.constant 0 : index
    %68 = vector.load %arg8[%c0_91, %c0_92] : memref<32x128xf32, #tpu.memory_space<vmem>>, vector<32x128xf32>
    %c7 = arith.constant 7 : index
    %c0_93 = arith.constant 0 : index
    %c0_94 = arith.constant 0 : index
    %69 = vector.load %arg3[%c7, %c0_93, %c0_94] : memref<9x192x128xf32, #tpu.memory_space<vmem>>, vector<1x192x128xf32>
    %70 = vector.shape_cast %69 : vector<1x192x128xf32> to vector<192x128xf32>
    %cst_95 = arith.constant dense<0.000000e+00> : vector<32x128xf32>
    %71 = tpu.matmul %67, %70, %cst_95 {dimension_numbers = #tpu.dot_dimension_numbers<[1], [0], [0], [1], [0, 0, 1, 1], [], []>} : vector<32x192xf32>, vector<192x128xf32>, vector<32x128xf32> -> vector<32x128xf32>
    %72 = arith.addf %68, %71 : vector<32x128xf32>
    %c0_96 = arith.constant 0 : index
    %c0_97 = arith.constant 0 : index
    %73 = vector.load %arg8[%c0_96, %c0_97] : memref<32x128xf32, #tpu.memory_space<vmem>>, vector<32x128xf32>
    tpu.vector_store %arg8[%c0_96, %c0_97], %72 {strides = array<i32>} : memref<32x128xf32, #tpu.memory_space<vmem>>, vector<32x128xf32>,
    %c0_98 = arith.constant 0 : index
    %c0_99 = arith.constant 0 : index
    %c2_100 = arith.constant 2 : index
    %c2_101 = arith.constant 2 : index
    %c0_102 = arith.constant 0 : index
    %74 = vector.load %arg2[%c0_98, %c0_99, %c2_100, %c2_101, %c0_102] : memref<1x1x6x10x192xf32, #tpu.memory_space<vmem>>, vector<1x1x4x8x192xf32>
    %75 = vector.shape_cast %74 : vector<1x1x4x8x192xf32> to vector<4x8x192xf32>
    %76 = vector.shape_cast %75 : vector<4x8x192xf32> to vector<32x192xf32>
    %c0_103 = arith.constant 0 : index
    %c0_104 = arith.constant 0 : index
    %77 = vector.load %arg8[%c0_103, %c0_104] : memref<32x128xf32, #tpu.memory_space<vmem>>, vector<32x128xf32>
    %c8 = arith.constant 8 : index
    %c0_105 = arith.constant 0 : index
    %c0_106 = arith.constant 0 : index
    %78 = vector.load %arg3[%c8, %c0_105, %c0_106] : memref<9x192x128xf32, #tpu.memory_space<vmem>>, vector<1x192x128xf32>
    %79 = vector.shape_cast %78 : vector<1x192x128xf32> to vector<192x128xf32>
    %cst_107 = arith.constant dense<0.000000e+00> : vector<32x128xf32>
    %80 = tpu.matmul %76, %79, %cst_107 {dimension_numbers = #tpu.dot_dimension_numbers<[1], [0], [0], [1], [0, 0, 1, 1], [], []>} : vector<32x192xf32>, vector<192x128xf32>, vector<32x128xf32> -> vector<32x128xf32>
    %81 = arith.addf %77, %80 : vector<32x128xf32>
    %c0_108 = arith.constant 0 : index
    %c0_109 = arith.constant 0 : index
    %82 = vector.load %arg8[%c0_108, %c0_109] : memref<32x128xf32, #tpu.memory_space<vmem>>, vector<32x128xf32>
    tpu.vector_store %arg8[%c0_108, %c0_109], %81 {strides = array<i32>} : memref<32x128xf32, #tpu.memory_space<vmem>>, vector<32x128xf32>,
    %c0_110 = arith.constant 0 : index
    %c0_111 = arith.constant 0 : index
    %83 = vector.load %arg8[%c0_110, %c0_111] : memref<32x128xf32, #tpu.memory_space<vmem>>, vector<32x128xf32>
    %c0_112 = arith.constant 0 : index
    %c0_113 = arith.constant 0 : index
    %84 = vector.load %arg4[%c0_112, %c0_113] : memref<1x128xf32, #tpu.memory_space<vmem>>, vector<1x128xf32>
    %85 = vector.shape_cast %84 : vector<1x128xf32> to vector<128xf32>
    %86 = vector.shape_cast %85 : vector<128xf32> to vector<1x128xf32>
    %87 = vector.broadcast %86 : vector<1x128xf32> to vector<32x128xf32>
    %88 = arith.addf %83, %87 : vector<32x128xf32>
    %cst_114 = arith.constant 0.000000e+00 : f32
    %89 = vector.broadcast %cst_114 : f32 to vector<32x128xf32>
    %90 = arith.maximumf %88, %89 : vector<32x128xf32>
    %c0_115 = arith.constant 0 : index
    %c0_116 = arith.constant 0 : index
    %91 = vector.load %arg5[%c0_115, %c0_116] : memref<128x128xf32, #tpu.memory_space<vmem>>, vector<128x128xf32>
    %cst_117 = arith.constant dense<0.000000e+00> : vector<32x128xf32>
    %92 = tpu.matmul %90, %91, %cst_117 {dimension_numbers = #tpu.dot_dimension_numbers<[1], [0], [0], [1], [0, 0, 1, 1], [], []>} : vector<32x128xf32>, vector<128x128xf32>, vector<32x128xf32> -> vector<32x128xf32>
    %c0_118 = arith.constant 0 : index
    %c0_119 = arith.constant 0 : index
    %93 = vector.load %arg6[%c0_118, %c0_119] : memref<1x128xf32, #tpu.memory_space<vmem>>, vector<1x128xf32>
    %94 = vector.shape_cast %93 : vector<1x128xf32> to vector<128xf32>
    %95 = vector.shape_cast %94 : vector<128xf32> to vector<1x128xf32>
    %96 = vector.broadcast %95 : vector<1x128xf32> to vector<32x128xf32>
    %97 = arith.addf %92, %96 : vector<32x128xf32>
    %c0_120 = arith.constant 0 : index
    %c0_121 = arith.constant 0 : index
    %c0_122 = arith.constant 0 : index
    %c0_123 = arith.constant 0 : index
    %98 = vector.load %arg7[%c0_120, %c0_121, %c0_122, %c0_123] : memref<1x1x32x128xf32, #tpu.memory_space<vmem>>, vector<1x1x32x128xf32>
    %99 = vector.shape_cast %98 : vector<1x1x32x128xf32> to vector<32x128xf32>
    %100 = vector.shape_cast %97 : vector<32x128xf32> to vector<1x1x32x128xf32>
    tpu.vector_store %arg7[%c0_120, %c0_121, %c0_122, %c0_123], %100 {strides = array<i32>} : memref<1x1x32x128xf32, #tpu.memory_space<vmem>>, vector<1x1x32x128xf32>,
    return
  }
  func.func @transform_0(%arg0: i32, %arg1: i32) -> (i32, i32, i32, i32, i32) {
    %c0_i32 = arith.constant 0 : i32
    %c0_i32_0 = arith.constant 0 : i32
    %c0_i32_1 = arith.constant 0 : i32
    %c0_i32_2 = arith.constant 0 : i32
    return %arg0, %arg1, %c0_i32, %c0_i32_0, %c0_i32_1 : i32, i32, i32, i32, i32
  }
  func.func @transform_1(%arg0: i32, %arg1: i32) -> (i32, i32, i32) {
    %c0_i32 = arith.constant 0 : i32
    %c0_i32_0 = arith.constant 0 : i32
    %c0_i32_1 = arith.constant 0 : i32
    %c0_i32_2 = arith.constant 0 : i32
    return %c0_i32, %c0_i32_0, %c0_i32_1 : i32, i32, i32
  }
  func.func @transform_2(%arg0: i32, %arg1: i32) -> (i32, i32) {
    %c0_i32 = arith.constant 0 : i32
    %c0_i32_0 = arith.constant 0 : i32
    %c0_i32_1 = arith.constant 0 : i32
    return %c0_i32, %c0_i32_0 : i32, i32
  }
  func.func @transform_3(%arg0: i32, %arg1: i32) -> (i32, i32) {
    %c0_i32 = arith.constant 0 : i32
    %c0_i32_0 = arith.constant 0 : i32
    %c0_i32_1 = arith.constant 0 : i32
    return %c0_i32, %c0_i32_0 : i32, i32
  }
  func.func @transform_4(%arg0: i32, %arg1: i32) -> (i32, i32) {
    %c0_i32 = arith.constant 0 : i32
    %c0_i32_0 = arith.constant 0 : i32
    %c0_i32_1 = arith.constant 0 : i32
    return %c0_i32, %c0_i32_0 : i32, i32
  }
  func.func @transform_5(%arg0: i32, %arg1: i32) -> (i32, i32, i32, i32) {
    %c0_i32 = arith.constant 0 : i32
    %c0_i32_0 = arith.constant 0 : i32
    %c0_i32_1 = arith.constant 0 : i32
    return %arg0, %arg1, %c0_i32, %c0_i32_0 : i32, i32, i32, i32
  }
}

</mosaic_0001>

<bundles_post_ra>
// kernel: tpu_custom_call.1
= control target key start
LH: loop header
LB: loop body
LE: loop exit
PB: predicated region body
PF: predicated region fallthrough
CT: control target
= control target key end

     0   :  { %10 = vsyncpa [#allocation4], 0  ;;  %s2678_s0 = inlined_call_operand.vmem [shape: f32[2,2,6,10,192], index: 0, kind: input, shape index: {}]   ;;  %s2679_s1 = inlined_call_operand.hbm [shape: f32[9,192,128], index: 1, kind: input, shape index: {}]   ;;  %s2680_s2 = inlined_call_operand.vmem [shape: f32[1,128], index: 2, kind: input, shape index: {}]   ;;  %s2681_s3 = inlined_call_operand.vmem [shape: f32[128,128], index: 3, kind: input, shape index: {}]   ;;  %s2682_s4 = inlined_call_operand.vmem [shape: f32[1,128], index: 4, kind: input, shape index: {}]   ;;  %s2683_s5 = inlined_call_operand.hbm [shape: f32[2,2,32,128], index: 5, kind: output, shape index: {}]  }
   0x1   :  { %11 = vsyncpa [#allocation5], 0 }
   0x2   :  { %13 = vsyncpa [#allocation5 + $0x1], 0  ;;  %s2185_s18 = smov 0   ;;  %s2187_s19 = smov 0  }
   0x3   :  { %s2189_s20 = smov 0   ;;  %s2191_s21 = smov 0  }
   0x4   :  { %s2193_s22 = smov 0   ;;  %s2195_s23 = smov 0  }
   0x5   :  { %s2197_s24 = smov 0   ;;  %s2199_s25 = smov 0  }
   0x6 LB: > { %s1783_s26 = sadd.s32 4294967295, %s2148_s25   ;;  %s1784_s27 = sadd.s32 4294967294, %s2148_s25   ;;  %s2148_s25 = sphi %s2199_s25, %s19_s25   ;;  %s2144_s24 = sphi %s2197_s24, %s2694_s24   ;;  %s2140_s23 = sphi %s2195_s23, %s2693_s23   ;;  %s2136_s22 = sphi %s2193_s22, %s2692_s22   ;;  %s2132_s21 = sphi %s2191_s21, %s2691_s21   ;;  %s2128_s20 = sphi %s2189_s20, %s2690_s20   ;;  %s2124_s19 = sphi %s2187_s19, %s2689_s19   ;;  %s2120_s18 = sphi %s2185_s18, %s2688_s18  }
   0x7   : > { %s28_s28 = sadd.s32 1, %s2140_s23  ;;  %s31_s29 = sadd.s32 1, %s2144_s24 }
   0x8   : > { %p29_p0 = scmp.ge.s32.totalorder %s28_s28, 2  ;;  %s152_s30 = sadd.s32 1, %s2128_s20 }
   0x9   : > { %p162_p1 = scmp.ne.s32.totalorder %s2128_s20, %s2124_s19  ;;  %p163_p2 = scmp.eq.s32.totalorder %s1783_s26, 3 }
   0xa   : > { %s2696_s28 = smov (%p29_p0, %s28_s28), 0  ;;  %s2698_s29 = smov (!%p29_p0, %s31_s29), %s2144_s24 }
   0xb   : > { %s148_s6 = ssub.s32 %s2140_s23, %s2696_s28  ;;  %p2237_p3 = por %p163_p2, %p162_p1 }
   0xc   : > { %p33_p4 = scmp.ge.s32.totalorder %s2698_s29, 2  ;;  %p168_p5 = scmp.ne.s32.totalorder %s2124_s19, %s2120_s18 }
   0xd   : > { %p169_p6 = scmp.eq.s32.totalorder %s1784_s27, 3  ;;  %p1785_p7 = scmp.ge.s32.totalorder %s2148_s25, 1 }
   0xe   : > { %s2700_s29 = smov (%p33_p4, %s2698_s29), 0  ;;  %p176_p9 = scmp.lt.s32.totalorder %s2148_s25, 5 }
   0xf   : > { %p2246_p8 = por %p169_p6, %p168_p5  ;;  %s147_s9 = ssub.s32 %s2144_s24, %s2700_s29 }
  0x10   : > { %s149_s10 = sor.u32 %s148_s6, %s147_s9  ;;  %p2253_p10 = pnand %p1785_p7, %p176_p9 }
  0x11   : > { %p150_p11 = scmp.eq.s32.totalorder %s149_s10, 0  ;;  %p2257_p12 = scmp.eq.s32.totalorder %s1783_s26, 0 }
  0x12   : > { %p1938_p13 = pneg %p2253_p10  ;;  %s187_s15 = sshll.u32 %s2679_s1, 4  ;;  %s188_s15 = int_to_ptr.hbm [resolvable:$true] %s187_s15 }
  0x13   : > { %s2267_s16 = scalar_select %p150_p11, %s2128_s20, %s152_s30  }
  0x14   : > { %s2150_s17 = smov [#allocation3]   ;;  %p1939_p0 = pnand %p2257_p12, %p1938_p13 }
  0x15   : > { %s189_s27 = sshll.u32 %s2150_s17, 4  ;;  %s2151_s6 = smov 128   ;;  %s190_s27 = int_to_ptr.vmem [resolvable:$true] %s189_s27 }
  0x16   : > { %s2152_s26 = smov 8   ;;  %226 = sbr.rel (%p2253_p10) target bundleno = 477 (0x1dd), region = 40 }
  0x17   : > { %1941 = dma.hbm_to_vmem [thread:$0]  (!%p1939_p0), %s188_s15, 27648, %s190_s27, [#allocation4], %s2151_s6, %s2151_s6, %s2152_s26  }
  0x1b   : > { %2111 = dma.done.wait (%p2257_p12), [#allocation4], 27648  }
  0x1c   : > { %2113 = vsyncadd (%p2257_p12), [#allocation4], 4294939648  ;;  %p259_p1 = scmp.lt.s32.totalorder %s2136_s22, 1  ;;  %p261_p2 = scmp.lt.s32.totalorder %s2132_s21, 1  ;;  %v299_v0 = vld [vmem:[#allocation3 + $0x78] sm:$0xff]  ;;  %v298_v3 = vld [vmem:[#allocation3 + $0x70] sm:$0xff] }
  0x1d   : > { %v468_v1 = vld [vmem:[#allocation3 + $0x138] sm:$0xff]  ;;  %321 = vmatpush.msra.mxu0 %v299_v0  ;;  %v467_v4 = vld [vmem:[#allocation3 + $0x130] sm:$0xff]  ;;  %v297_v6 = vld [vmem:[#allocation3 + $0x68] sm:$0xff]  ;;  %vm419_vm0 = vcmask 1046528   ;;  %vm308_vm1 = vcmask 523264   ;;  %vm583_vm2 = vcmask 1045504  }
  0x1e   : > { %s260_s30 = scalar_select %p259_p1, %s2136_s22, 1  ;;  %v476_v2 = vld [vmem:[#allocation3 + $0x178] sm:$0xff]  ;;  %485 = vmatpush.msra.mxu2 %v468_v1  ;;  %v475_v5 = vld [vmem:[#allocation3 + $0x170] sm:$0xff]  ;;  %v466_v7 = vld [vmem:[#allocation3 + $0x128] sm:$0xff] }
  0x1f   : > { %s262_s9 = scalar_select %p261_p2, %s2132_s21, 1  ;;  %522 = vmatpush.msra.mxu3 %v476_v2  ;;  %322 = vmatpush.msra.mxu0 %v298_v3  ;;  %v474_v8 = vld [vmem:[#allocation3 + $0x168] sm:$0xff]  ;;  %v307_v9 = vld [vmem:[#allocation3 + $0xb8] sm:$0xff]  ;;  %v296_v10 = vld [vmem:[#allocation3 + $0x60] sm:$0xff] }
  0x20   : > { %s1931_s10 = smul.u32 48, %s260_s30  ;;  %486 = vmatpush.msra.mxu2 %v467_v4  ;;  %358 = vmatpush.msra.mxu1 %v307_v9  ;;  %v465_v11 = vld [vmem:[#allocation3 + $0x120] sm:$0xff]  ;;  %v306_v12 = vld [vmem:[#allocation3 + $0xb0] sm:$0xff]  ;;  %v295_v14 = vld [vmem:[#allocation3 + $0x58] sm:$0xff]  ;;  %s256_s15 = sand.u32 1, %s2124_s19  }
  0x21   : > { %s1930_s13 = smul.u32 24, %s262_s9  ;;  %523 = vmatpush.msra.mxu3 %v475_v5  ;;  %323 = vmatpush.msra.mxu0 %v297_v6  ;;  %v473_v13 = vld [vmem:[#allocation3 + $0x160] sm:$0xff]  ;;  %v464_v15 = vld [vmem:[#allocation3 + $0x118] sm:$0xff]  ;;  %v305_v16 = vld [vmem:[#allocation3 + $0xa8] sm:$0xff]  ;;  %s1909_s30 = sshll.u32 %s2132_s21, 2 }
  0x22   : > { %487 = vmatpush.msra.mxu2 %v466_v7  ;;  %359 = vmatpush.msra.mxu1 %v306_v12  ;;  %v472_v17 = vld [vmem:[#allocation3 + $0x158] sm:$0xff]  ;;  %v304_v18 = vld [vmem:[#allocation3 + $0xa0] sm:$0xff]  ;;  %v294_v19 = vld [vmem:[#allocation3 + $0x50] sm:$0xff]  ;;  %s1910_s9 = sshll.u32 %s2136_s22, 3 }
  0x23   : > { %s265_s11 = sadd.s32 %s1931_s10, %s1930_s13  ;;  %524 = vmatpush.msra.mxu3 %v474_v8  ;;  %324 = vmatpush.msra.mxu0 %v296_v10  ;;  %v463_v20 = vld [vmem:[#allocation3 + $0x110] sm:$0xff]  ;;  %v303_v22 = vld [vmem:[#allocation3 + $0x98] sm:$0xff]  ;;  %v293_v24 = vld [vmem:[#allocation3 + $0x48] sm:$0xff]  ;;  %s1680_s10 = sadd.s32 %s1910_s9, %s1909_s30 }
  0x24   : > { %s1791_s12 = sshll.u32 %s265_s11, 3  ;;  %488 = vmatpush.msra.mxu2 %v465_v11  ;;  %360 = vmatpush.msra.mxu1 %v305_v16  ;;  %v471_v21 = vld [vmem:[#allocation3 + $0x150] sm:$0xff]  ;;  %v462_v25 = vld [vmem:[#allocation3 + $0x108] sm:$0xff]  ;;  %v292_v31 = vld [vmem:[#allocation3 + $0x40] sm:$0xff]  ;;  %s1911_s13 = sshll.u32 %s1680_s10, 3 }
  0x25   : > { %s2284_s17 = scalar_lea.vmem %s2678_s0, %s1791_s12  ;;  %525 = vmatpush.msra.mxu3 %v473_v13  ;;  %325 = vmatpush.msra.mxu0 %v295_v14  ;;  %v470_v28 = vld [vmem:[#allocation3 + $0x148] sm:$0xff]  ;;  %v302_v30 = vld [vmem:[#allocation3 + $0x90] sm:$0xff]  ;;  %v461_v32 = vld [vmem:[#allocation3 + $0x100] sm:$0xff]  ;;  %s1682_s14 = scalar_lea.hbm %s2683_s5, %s1911_s13 }
  0x26   : > { %489 = vmatpush.msra.mxu2 %v464_v15  ;;  %v388_v23 = vld [vmem:[%s2284_s17 + $0x8] sm:$0xfe]  ;;  %361 = vmatpush.msra.mxu1 %v304_v18  ;;  %v390_v26 = vld [vmem:[%s2284_s17 + $0x18] sm:$0x1]  ;;  %v469_v33 = vld [vmem:[#allocation3 + $0x140] sm:$0xff]  ;;  %s1685_s6 = sshll.u32 %s1682_s14, 4  ;;  %s1686_s6 = int_to_ptr.hbm [resolvable:$true] %s1685_s6 }
  0x27   : > { %526 = vmatpush.msra.mxu3 %v472_v17  ;;  %v423_v27 = vrot.slane %v388_v23, 1  ;;  %326 = vmatpush.msra.mxu0 %v294_v19  ;;  %v424_v29 = vrot.slane %v390_v26, 1  ;;  %v301_v34 = vld [vmem:[#allocation3 + $0x88] sm:$0xff]  ;;  %v640_v36 = vld [vmem:[#allocation3 + $0x238] sm:$0xff]  ;;  %v290_v41 = vld [vmem:[#allocation3 + $0x30] sm:$0xff]  ;;  %s2064_s21 = sshra.s32 %s1686_s6, 4  ;;  %s2065_s21 = int_to_ptr.hbm [resolvable:$true] %s2064_s21 }
  0x28   : > { %490 = vmatpush.msra.mxu2 %v463_v20  ;;  %362 = vmatpush.msra.mxu1 %v303_v22  ;;  %v291_v37 = vld [vmem:[#allocation3 + $0x38] sm:$0xff]  ;;  %v392_v39 = vld [vmem:[%s2284_s17 + $0x28] sm:$0xfe]  ;;  %v300_v42 = vld [vmem:[#allocation3 + $0x80] sm:$0xff]  ;;  %s2066_s22 = scalar_lea.hbm %s2065_s21, 32  ;;  %s2070_s10 = scalar_lea.hbm %s2683_s5, 128 }
  0x29   : > { %527 = vmatpush.msra.mxu3 %v471_v21  ;;  %327 = vmatpush.msra.mxu0 %v293_v24  ;;  %v425_v35 = vsel %vm419_vm0, %v423_v27, %v424_v29  ;;  %v460_v38 = vld [vmem:[#allocation3 + $0xf8] sm:$0xff]  ;;  %v459_v43 = vld [vmem:[#allocation3 + $0xf0] sm:$0xff]  ;;  %v289_v45 = vld [vmem:[#allocation3 + $0x28] sm:$0xff]  ;;  %v429_v47 = vrot.slane %v392_v39, 1  ;;  %p2067_p4 = scmp.ne.s32.totalorder %s2065_s21, %s2066_s22  ;;  %p2071_p7 = scmp.lt.s32.totalorder %s2065_s21, %s2683_s5 }
  0x2a   : > { %491 = vmatpush.msra.mxu2 %v462_v25  ;;  %363 = vmatpush.msra.mxu1 %v302_v30  ;;  %v394_v40 = vld [vmem:[%s2284_s17 + $0x38] sm:$0x1]  ;;  %v639_v44 = vld [vmem:[#allocation3 + $0x230] sm:$0xff]  ;;  %v273_v46 = vld [vmem:[%s2284_s17 + $0x8] sm:$0xff]  ;;  %p2072_p9 = scmp.lt.s32.totalorder %s2070_s10, %s2066_s22 }
  0x2b   : > { %528 = vmatpush.msra.mxu3 %v470_v28  ;;  %328 = vmatpush.msra.mxu0 %v292_v31  ;;  %v430_v48 = vrot.slane %v394_v40, 1  ;;  %v458_v49 = vld [vmem:[#allocation3 + $0xe8] sm:$0xff]  ;;  %v632_v50 = vld [vmem:[#allocation3 + $0x1f8] sm:$0xff]  ;;  %v288_v51 = vld [vmem:[#allocation3 + $0x20] sm:$0xff]  ;;  %p2068_p5 = pnand %p2067_p4, %p2237_p3 }
  0x2c   : > { %492 = vmatpush.msra.mxu2 %v461_v32  ;;  %364 = vmatpush.msra.mxu1 %v301_v34  ;;  %v638_v52 = vld [vmem:[#allocation3 + $0x228] sm:$0xff]  ;;  %v457_v53 = vld [vmem:[#allocation3 + $0xe0] sm:$0xff]  ;;  %v631_v54 = vld [vmem:[#allocation3 + $0x1f0] sm:$0xff]  ;;  %p2073_p10 = por %p2072_p9, %p2071_p7 }
  0x2d   : > { %529 = vmatpush.msra.mxu3 %v469_v33  ;;  %329 = vmatpush.msra.mxu0 %v291_v37  ;;  %v287_v55 = vld [vmem:[#allocation3 + $0x18] sm:$0xff]  ;;  %v431_v56 = vsel %vm419_vm0, %v429_v47, %v430_v48  ;;  %v630_v58 = vld [vmem:[#allocation3 + $0x1e8] sm:$0xff]  ;;  %v387_v59 = vld [vmem:[%s2284_s17] sm:$0xfe]  ;;  %p2069_p6 = pneg %p2068_p5 }
  0x2e   : > { %1796 = vmatmul.msk.f32.vlgmr.msra.gmra.mxu3 %vm308_vm1, %v425_v35  ;;  %493 = vmatpush.msra.mxu2 %v460_v38  ;;  %v456_v57 = vld [vmem:[#allocation3 + $0xd8] sm:$0xff]  ;;  %v389_v60 = vld [vmem:[%s2284_s17 + $0x10] sm:$0x1]  ;;  %v396_v61 = vld [vmem:[%s2284_s17 + $0x48] sm:$0xfe]  ;;  %v420_v5 = vrot.slane %v387_v59, 1 }
  0x2f   : > { %686 = vmatpush.msrb.mxu3 %v640_v36  ;;  %330 = vmatpush.msra.mxu0 %v290_v41  ;;  %v398_v62 = vld [vmem:[%s2284_s17 + $0x58] sm:$0x1]  ;;  %v286_v63 = vld [vmem:[#allocation3 + $0x10] sm:$0xff]  ;;  %v637_v0 = vld [vmem:[#allocation3 + $0x220] sm:$0xff]  ;;  %v421_v6 = vrot.slane %v389_v60, 1  ;;  %v435_v7 = vrot.slane %v396_v61, 1  ;;  %p2074_p11 = pnand %p2073_p10, %p2069_p6 }
  0x30   : > { %365 = vmatpush.msra.mxu1 %v300_v42  ;;  %494 = vmatpush.msra.mxu2 %v459_v43  ;;  %v455_v1 = vld [vmem:[#allocation3 + $0xd0] sm:$0xff]  ;;  %v629_v2 = vld [vmem:[#allocation3 + $0x1e0] sm:$0xff]  ;;  %v285_v3 = vld [vmem:[#allocation3 + $0x8] sm:$0xff]  ;;  %v436_v8 = vrot.slane %v398_v62, 1 }
  0x31   : > { %687 = vmatpush.msrb.mxu3 %v639_v44  ;;  %331 = vmatpush.msra.mxu0 %v289_v45  ;;  %v2301_v4 = vld [vmem:[%s2284_s17 + $0x28] sm:$0xff]  ;;  %v628_v10 = vld [vmem:[#allocation3 + $0x1d8] sm:$0xff]  ;;  %v284_v11 = vld [vmem:[#allocation3] sm:$0xff]  ;;  %v422_v15 = vsel %vm419_vm0, %v420_v5, %v421_v6 }
  0x32   : > { %1792 = vmatmul.msk.f32.vlgmr.msra.gmra.mxu1 %vm308_vm1, %v273_v46  ;;  %495 = vmatpush.msra.mxu2 %v458_v49  ;;  %v454_v9 = vld [vmem:[#allocation3 + $0xc8] sm:$0xff]  ;;  %v636_v12 = vld [vmem:[#allocation3 + $0x218] sm:$0xff]  ;;  %v453_v13 = vld [vmem:[#allocation3 + $0xc0] sm:$0xff]  ;;  %v437_v16 = vsel %vm419_vm0, %v435_v7, %v436_v8 }
  0x33   : > { %649 = vmatpush.msrb.mxu1 %v632_v50  ;;  %332 = vmatpush.msra.mxu0 %v288_v51  ;;  %v272_v14 = vld [vmem:[%s2284_s17] sm:$0xff]  ;;  %v627_v17 = vld [vmem:[#allocation3 + $0x1d0] sm:$0xff]  ;;  %v400_v21 = vld [vmem:[%s2284_s17 + $0x68] sm:$0xfe] }
  0x34   : > { %688 = vmatpush.msrb.mxu3 %v638_v52  ;;  %496 = vmatpush.msra.mxu2 %v457_v53  ;;  %v635_v18 = vld [vmem:[#allocation3 + $0x210] sm:$0xff]  ;;  %v391_v19 = vld [vmem:[%s2284_s17 + $0x20] sm:$0xfe]  ;;  %v402_v22 = vld [vmem:[%s2284_s17 + $0x78] sm:$0x1]  ;;  %v441_v30 = vrot.slane %v400_v21, 1 }
  0x35   : > { %650 = vmatpush.msrb.mxu1 %v631_v54  ;;  %333 = vmatpush.msra.mxu0 %v287_v55  ;;  %v393_v20 = vld [vmem:[%s2284_s17 + $0x30] sm:$0x1]  ;;  %v744_v23 = vld [vmem:[#allocation3 + $0x2b8] sm:$0xff]  ;;  %v626_v25 = vld [vmem:[#allocation3 + $0x1c8] sm:$0xff]  ;;  %v426_v28 = vrot.slane %v391_v19, 1  ;;  %v442_v31 = vrot.slane %v402_v22, 1 }
  0x36   : > { %1797 = vmatmul.msk.f32.gmra.mxu3 %vm308_vm1, %v431_v56  ;;  %497 = vmatpush.msra.mxu2 %v456_v57  ;;  %v752_v24 = vld [vmem:[#allocation3 + $0x2f8] sm:$0xff]  ;;  %v634_v26 = vld [vmem:[#allocation3 + $0x208] sm:$0xff]  ;;  %v427_v29 = vrot.slane %v393_v20, 1  ;;  %v743_v32 = vld [vmem:[#allocation3 + $0x2b0] sm:$0xff] }
  0x37   : > { %651 = vmatpush.msrb.mxu1 %v630_v58  ;;  %334 = vmatpush.msra.mxu0 %v286_v63  ;;  %v2314_v27 = vld [vmem:[%s2284_s17 + $0x48] sm:$0xff]  ;;  %v625_v33 = vld [vmem:[#allocation3 + $0x1c0] sm:$0xff]  ;;  %v919_v36 = vld [vmem:[#allocation3 + $0x3b8] sm:$0xff]  ;;  %v443_v40 = vsel %vm419_vm0, %v441_v30, %v442_v31 }
  0x38   : > { %689 = vmatpush.msrb.mxu3 %v637_v0  ;;  %498 = vmatpush.msra.mxu2 %v455_v1  ;;  %v633_v34 = vld [vmem:[#allocation3 + $0x200] sm:$0xff]  ;;  %v742_v35 = vld [vmem:[#allocation3 + $0x2a8] sm:$0xff]  ;;  %v624_v37 = vld [vmem:[#allocation3 + $0x1b8] sm:$0xff]  ;;  %v428_v39 = vsel %vm419_vm0, %v426_v28, %v427_v29 }
  0x39   : > { %652 = vmatpush.msrb.mxu1 %v629_v2  ;;  %335 = vmatpush.msra.mxu0 %v285_v3  ;;  %v2319_v38 = vld [vmem:[%s2284_s17 + $0x20] sm:$0xff]  ;;  %v623_v41 = vld [vmem:[#allocation3 + $0x1b0] sm:$0xff]  ;;  %v552_v45 = vld [vmem:[%s2284_s17 + $0x8] sm:$0xfc] }
  0x3a   : > { %1793 = vmatmul.msk.f32.gmra.mxu1 %vm308_vm1, %v2301_v4  ;;  %499 = vmatpush.msra.mxu2 %v454_v9  ;;  %v741_v42 = vld [vmem:[#allocation3 + $0x2a0] sm:$0xff]  ;;  %v397_v44 = vld [vmem:[%s2284_s17 + $0x50] sm:$0x1]  ;;  %v554_v46 = vld [vmem:[%s2284_s17 + $0x18] sm:$0x3]  ;;  %v587_v54 = vrot.slane %v552_v45, 2 }
  0x3b   : > { %653 = vmatpush.msrb.mxu1 %v628_v10  ;;  %336 = vmatpush.msra.mxu0 %v284_v11  ;;  %v395_v43 = vld [vmem:[%s2284_s17 + $0x40] sm:$0xfe]  ;;  %v751_v47 = vld [vmem:[#allocation3 + $0x2f0] sm:$0xff]  ;;  %v622_v49 = vld [vmem:[#allocation3 + $0x1a8] sm:$0xff]  ;;  %v433_v53 = vrot.slane %v397_v44, 1  ;;  %v588_v55 = vrot.slane %v554_v46, 2 }
  0x3c   : > { %690 = vmatpush.msrb.mxu3 %v636_v12  ;;  %500 = vmatpush.msra.mxu2 %v453_v13  ;;  %v918_v48 = vld [vmem:[#allocation3 + $0x3b0] sm:$0xff]  ;;  %v740_v50 = vld [vmem:[#allocation3 + $0x298] sm:$0xff]  ;;  %v2330_v51 = vld [vmem:[%s2284_s17 + $0x68] sm:$0xff]  ;;  %v432_v52 = vrot.slane %v395_v43, 1 }
  0x3d   : > { %337 = vmatmul.f32.vlgmr.msra.gmra.mxu0 %v272_v14  ;;  %501 = vmatmul.f32.vlgmr.msra.gmra.mxu2 %v422_v15  ;;  %v750_v56 = vld [vmem:[#allocation3 + $0x2e8] sm:$0xff]  ;;  %v621_v57 = vld [vmem:[#allocation3 + $0x1a0] sm:$0xff]  ;;  %v739_v58 = vld [vmem:[#allocation3 + $0x290] sm:$0xff]  ;;  %v589_v3 = vsel %vm583_vm2, %v587_v54, %v588_v55 }
  0x3e   : > { %1798 = vmatmul.msk.f32.gmra.mxu3 %vm308_vm1, %v437_v16  ;;  %654 = vmatpush.msrb.mxu1 %v627_v17  ;;  %v620_v59 = vld [vmem:[#allocation3 + $0x198] sm:$0xff]  ;;  %v749_v60 = vld [vmem:[#allocation3 + $0x2e0] sm:$0xff]  ;;  %v917_v61 = vld [vmem:[#allocation3 + $0x3a8] sm:$0xff]  ;;  %v434_v1 = vsel %vm419_vm0, %v432_v52, %v433_v53 }
  0x3f   : > { %691 = vmatpush.msrb.mxu3 %v635_v18  ;;  %765 = vmatpush.msrb.mxu0 %v744_v23  ;;  %v2335_v62 = vld [vmem:[%s2284_s17 + $0x40] sm:$0xff]  ;;  %v553_v0 = vld [vmem:[%s2284_s17 + $0x10] sm:$0x3]  ;;  %v738_v5 = vld [vmem:[#allocation3 + $0x288] sm:$0xff] }
  0x40   : > { %802 = vmatpush.msrb.mxu2 %v752_v24  ;;  %655 = vmatpush.msrb.mxu1 %v626_v25  ;;  %v551_v63 = vld [vmem:[%s2284_s17] sm:$0xfc]  ;;  %v619_v2 = vld [vmem:[#allocation3 + $0x190] sm:$0xff]  ;;  %v556_v8 = vld [vmem:[%s2284_s17 + $0x28] sm:$0xfc]  ;;  %v585_v11 = vrot.slane %v553_v0, 2 }
  0x41   : > { %692 = vmatpush.msrb.mxu3 %v634_v26  ;;  %766 = vmatpush.msrb.mxu0 %v743_v32  ;;  %v399_v6 = vld [vmem:[%s2284_s17 + $0x60] sm:$0xfe]  ;;  %v401_v7 = vld [vmem:[%s2284_s17 + $0x70] sm:$0x1]  ;;  %v558_v9 = vld [vmem:[%s2284_s17 + $0x38] sm:$0x3] }
  0x42   : > { %1794 = vmatmul.msk.f32.gmra.mxu1 %vm308_vm1, %v2314_v27  ;;  %803 = vmatpush.msrb.mxu2 %v751_v47  ;;  %v584_v10 = vrot.slane %v551_v63, 2  ;;  %v748_v12 = vld [vmem:[#allocation3 + $0x2d8] sm:$0xff]  ;;  %v916_v13 = vld [vmem:[#allocation3 + $0x3a0] sm:$0xff]  ;;  %v618_v14 = vld [vmem:[#allocation3 + $0x188] sm:$0xff]  ;;  %v438_v16 = vrot.slane %v399_v6, 1  ;;  %v439_v17 = vrot.slane %v401_v7, 1 }
  0x43   : > { %656 = vmatpush.msrb.mxu1 %v625_v33  ;;  %693 = vmatpush.msrb.mxu3 %v633_v34  ;;  %v737_v15 = vld [vmem:[#allocation3 + $0x280] sm:$0xff]  ;;  %v593_v18 = vrot.slane %v556_v8, 2  ;;  %v594_v19 = vrot.slane %v558_v9, 2  ;;  %v747_v20 = vld [vmem:[#allocation3 + $0x2d0] sm:$0xff]  ;;  %v915_v21 = vld [vmem:[#allocation3 + $0x398] sm:$0xff] }
  0x44   : > { %767 = vmatpush.msrb.mxu0 %v742_v35  ;;  %804 = vmatpush.msrb.mxu2 %v750_v56  ;;  %v617_v22 = vld [vmem:[#allocation3 + $0x180] sm:$0xff]  ;;  %v736_v23 = vld [vmem:[#allocation3 + $0x278] sm:$0xff]  ;;  %v586_v24 = vsel %vm583_vm2, %v584_v10, %v585_v11  ;;  %v746_v26 = vld [vmem:[#allocation3 + $0x2c8] sm:$0xff]  ;;  %v440_v31 = vsel %vm419_vm0, %v438_v16, %v439_v17 }
  0x45   : > { %965 = vmatpush.msra.mxu3 %v919_v36  ;;  %657 = vmatpush.msrb.mxu1 %v624_v37  ;;  %v911_v25 = vld [vmem:[#allocation3 + $0x378] sm:$0xff]  ;;  %v2349_v28 = vld [vmem:[%s2284_s17 + $0x60] sm:$0xff]  ;;  %v557_v30 = vld [vmem:[%s2284_s17 + $0x30] sm:$0x3]  ;;  %v595_v32 = vsel %vm583_vm2, %v593_v18, %v594_v19 }
  0x46   : > { %340 = vmatmul.f32.gmra.mxu0 %v2319_v38  ;;  %504 = vmatmul.f32.gmra.mxu2 %v428_v39  ;;  %v555_v29 = vld [vmem:[%s2284_s17 + $0x20] sm:$0xfc]  ;;  %v910_v33 = vld [vmem:[#allocation3 + $0x370] sm:$0xff]  ;;  %v560_v35 = vld [vmem:[%s2284_s17 + $0x48] sm:$0xfc]  ;;  %v591_v39 = vrot.slane %v557_v30, 2 }
  0x47   : > { %1799 = vmatmul.msk.f32.gmra.mxu3 %vm308_vm1, %v443_v40  ;;  %658 = vmatpush.msrb.mxu1 %v623_v41  ;;  %v735_v34 = vld [vmem:[#allocation3 + $0x270] sm:$0xff]  ;;  %v562_v36 = vld [vmem:[%s2284_s17 + $0x58] sm:$0x3]  ;;  %v590_v37 = vrot.slane %v555_v29, 2  ;;  %v745_v40 = vld [vmem:[#allocation3 + $0x2c0] sm:$0xff]  ;;  %v599_v44 = vrot.slane %v560_v35, 2 }
  0x48   : > { %768 = vmatpush.msrb.mxu0 %v741_v42  ;;  %966 = vmatpush.msra.mxu3 %v918_v48  ;;  %v914_v41 = vld [vmem:[#allocation3 + $0x390] sm:$0xff]  ;;  %v909_v42 = vld [vmem:[#allocation3 + $0x368] sm:$0xff]  ;;  %v600_v45 = vrot.slane %v562_v36, 2  ;;  %v1082_v47 = vld [vmem:[#allocation3 + $0x478] sm:$0xff] }
  0x49   : > { %659 = vmatpush.msrb.mxu1 %v622_v49  ;;  %805 = vmatpush.msrb.mxu2 %v749_v60  ;;  %v734_v43 = vld [vmem:[#allocation3 + $0x268] sm:$0xff]  ;;  %v908_v48 = vld [vmem:[#allocation3 + $0x360] sm:$0xff]  ;;  %v907_v52 = vld [vmem:[#allocation3 + $0x358] sm:$0xff] }
  0x4a   : > { %769 = vmatpush.msrb.mxu0 %v740_v50  ;;  %1795 = vmatmul.msk.f32.gmra.mxu1 %vm308_vm1, %v2330_v51  ;;  %v913_v46 = vld [vmem:[#allocation3 + $0x388] sm:$0xff]  ;;  %v733_v49 = vld [vmem:[#allocation3 + $0x260] sm:$0xff]  ;;  %v592_v50 = vsel %vm583_vm2, %v590_v37, %v591_v39  ;;  %v732_v54 = vld [vmem:[#allocation3 + $0x258] sm:$0xff] }
  0x4b   : > { %660 = vmatpush.msrb.mxu1 %v621_v57  ;;  %967 = vmatpush.msra.mxu3 %v917_v61  ;;  %v912_v53 = vld [vmem:[#allocation3 + $0x380] sm:$0xff]  ;;  %v561_v56 = vld [vmem:[%s2284_s17 + $0x50] sm:$0x3]  ;;  %v601_v57 = vsel %vm583_vm2, %v599_v44, %v600_v45  ;;  %v564_v60 = vld [vmem:[%s2284_s17 + $0x68] sm:$0xfc] }
  0x4c   : > { %770 = vmatpush.msrb.mxu0 %v739_v58  ;;  %806 = vmatpush.msrb.mxu2 %v748_v12  ;;  %v559_v55 = vld [vmem:[%s2284_s17 + $0x40] sm:$0xfc]  ;;  %v906_v58 = vld [vmem:[#allocation3 + $0x350] sm:$0xff]  ;;  %v566_v61 = vld [vmem:[%s2284_s17 + $0x78] sm:$0x3]  ;;  %v597_v0 = vrot.slane %v561_v56, 2 }
  0x4d   : > { %661 = vmatpush.msrb.mxu1 %v620_v59  ;;  %968 = vmatpush.msra.mxu3 %v916_v13  ;;  %v731_v59 = vld [vmem:[#allocation3 + $0x250] sm:$0xff]  ;;  %v596_v63 = vrot.slane %v559_v55, 2  ;;  %v605_v6 = vrot.slane %v564_v60, 2  ;;  %v606_v7 = vrot.slane %v566_v61, 2  ;;  %v1080_v9 = vld [vmem:[#allocation3 + $0x468] sm:$0xff]  ;;  %v904_v10 = vld [vmem:[#allocation3 + $0x340] sm:$0xff] }
  0x4e   : > { %343 = vmatmul.f32.gmra.mxu0 %v2335_v62  ;;  %507 = vmatmul.f32.gmra.mxu2 %v434_v1  ;;  %v1194_v1 = vld [vmem:[#allocation3 + $0x538] sm:$0xff]  ;;  %v1193_v8 = vld [vmem:[#allocation3 + $0x530] sm:$0xff]  ;;  %v729_v11 = vld [vmem:[#allocation3 + $0x240] sm:$0xff] }
  0x4f   : > { %1800 = vmatmul.msk.f32.vlgmr.msrb.gmra.mxu3 %vm308_vm1, %v589_v3  ;;  %662 = vmatpush.msrb.mxu1 %v619_v2  ;;  %v1081_v2 = vld [vmem:[#allocation3 + $0x470] sm:$0xff]  ;;  %v905_v3 = vld [vmem:[#allocation3 + $0x348] sm:$0xff]  ;;  %v903_v12 = vld [vmem:[#allocation3 + $0x338] sm:$0xff]  ;;  %v607_v16 = vsel %vm583_vm2, %v605_v6, %v606_v7 }
  0x50   : > { %771 = vmatpush.msrb.mxu0 %v738_v5  ;;  %807 = vmatpush.msrb.mxu2 %v747_v20  ;;  %v730_v5 = vld [vmem:[#allocation3 + $0x248] sm:$0xff]  ;;  %v1074_v13 = vld [vmem:[#allocation3 + $0x438] sm:$0xff]  ;;  %v902_v17 = vld [vmem:[#allocation3 + $0x330] sm:$0xff] }
  0x51   : > { %663 = vmatpush.msrb.mxu1 %v618_v14  ;;  %969 = vmatpush.msra.mxu3 %v915_v21  ;;  %v563_v14 = vld [vmem:[%s2284_s17 + $0x60] sm:$0xfc]  ;;  %v1073_v18 = vld [vmem:[#allocation3 + $0x430] sm:$0xff]  ;;  %v1817_v19 = vld [vmem:[%s2284_s17 + $0x28] sm:$0xfe] }
  0x52   : > { %772 = vmatpush.msrb.mxu0 %v737_v15  ;;  %808 = vmatpush.msrb.mxu2 %v746_v26  ;;  %v565_v15 = vld [vmem:[%s2284_s17 + $0x70] sm:$0x3]  ;;  %v1819_v20 = vld [vmem:[%s2284_s17 + $0x38] sm:$0x1]  ;;  %v602_v21 = vrot.slane %v563_v14, 2  ;;  %v1072_v26 = vld [vmem:[#allocation3 + $0x428] sm:$0xff] }
  0x53   : > { %664 = vmatpush.msrb.mxu1 %v617_v22  ;;  %970 = vmatpush.msra.mxu3 %v914_v41  ;;  %v603_v22 = vrot.slane %v565_v15, 2  ;;  %v867_v29 = vrot.slane %v1819_v20, 1  ;;  %v1078_v30 = vld [vmem:[#allocation3 + $0x458] sm:$0xff]  ;;  %v1816_v37 = vld [vmem:[%s2284_s17 + $0x20] sm:$0xfe]  ;;  %v1189_v55 = vld [vmem:[#allocation3 + $0x510] sm:$0xff] }
  0x54   : > { %773 = vmatpush.msrb.mxu0 %v736_v23  ;;  %665 = vmatmul.f32.vlgmr.msrb.gmra.mxu1 %v586_v24  ;;  %v1079_v23 = vld [vmem:[#allocation3 + $0x460] sm:$0xff]  ;;  %v1192_v24 = vld [vmem:[#allocation3 + $0x528] sm:$0xff]  ;;  %v899_v35 = vld [vmem:[#allocation3 + $0x318] sm:$0xff]  ;;  %v863_v45 = vrot.slane %v1816_v37, 1 }
  0x55   : > { %928 = vmatpush.msra.mxu1 %v911_v25  ;;  %809 = vmatpush.msrb.mxu2 %v745_v40  ;;  %v901_v25 = vld [vmem:[#allocation3 + $0x328] sm:$0xff]  ;;  %v1070_v36 = vld [vmem:[#allocation3 + $0x418] sm:$0xff]  ;;  %v1818_v39 = vld [vmem:[%s2284_s17 + $0x30] sm:$0x1] }
  0x56   : > { %346 = vmatmul.f32.gmra.mxu0 %v2349_v28  ;;  %510 = vmatmul.f32.gmra.mxu2 %v440_v31  ;;  %v1191_v31 = vld [vmem:[#allocation3 + $0x520] sm:$0xff]  ;;  %v898_v40 = vld [vmem:[#allocation3 + $0x310] sm:$0xff]  ;;  %v1823_v44 = vld [vmem:[%s2284_s17 + $0x58] sm:$0x1] }
  0x57   : > { %1801 = vmatmul.msk.f32.gmra.mxu3 %vm308_vm1, %v595_v32  ;;  %929 = vmatpush.msra.mxu1 %v910_v33  ;;  %v900_v32 = vld [vmem:[#allocation3 + $0x320] sm:$0xff]  ;;  %v1066_v60 = vld [vmem:[#allocation3 + $0x3f8] sm:$0xff]  ;;  %v2390_v61 = vld [vmem:[%s2284_s17 + $0x88] sm:$0xff] }
  0x58   : > { %774 = vmatpush.msrb.mxu0 %v735_v34  ;;  %971 = vmatpush.msra.mxu3 %v913_v46  ;;  %v1071_v33 = vld [vmem:[#allocation3 + $0x420] sm:$0xff]  ;;  %v604_v34 = vsel %vm583_vm2, %v602_v21, %v603_v22  ;;  %v864_v46 = vrot.slane %v1818_v39, 1  ;;  %v1827_v6 = vld [vmem:[%s2284_s17 + $0x78] sm:$0x1]  ;;  %v1837_v7 = vld [vmem:[%s2284_s17 + $0x28] sm:$0xfc] }
  0x59   : > { %930 = vmatpush.msra.mxu1 %v909_v42  ;;  %1128 = vmatpush.msra.mxu2 %v1082_v47  ;;  %v1069_v42 = vld [vmem:[#allocation3 + $0x410] sm:$0xff]  ;;  %v896_v56 = vld [vmem:[#allocation3 + $0x300] sm:$0xff]  ;;  %v879_v15 = vrot.slane %v1827_v6, 1  ;;  %v1841_v37 = vld [vmem:[%s2284_s17 + $0x48] sm:$0xfc] }
  0x5a   : > { %775 = vmatpush.msrb.mxu0 %v734_v43  ;;  %972 = vmatpush.msra.mxu3 %v912_v53  ;;  %v1821_v43 = vld [vmem:[%s2284_s17 + $0x48] sm:$0xfe]  ;;  %v1077_v47 = vld [vmem:[#allocation3 + $0x450] sm:$0xff]  ;;  %v873_v53 = vrot.slane %v1823_v44, 1  ;;  %v1183_v20 = vld [vmem:[#allocation3 + $0x4e0] sm:$0xff] }
  0x5b   : > { %931 = vmatpush.msra.mxu1 %v908_v48  ;;  %1129 = vmatpush.msra.mxu2 %v1081_v2  ;;  %v1190_v48 = vld [vmem:[#allocation3 + $0x518] sm:$0xff]  ;;  %v1063_v21 = vld [vmem:[#allocation3 + $0x3e0] sm:$0xff]  ;;  %v1177_v6 = vld [vmem:[#allocation3 + $0x4b0] sm:$0xff] }
  0x5c   : > { %776 = vmatpush.msrb.mxu0 %v733_v49  ;;  %668 = vmatmul.f32.gmra.mxu1 %v592_v50  ;;  %v897_v49 = vld [vmem:[#allocation3 + $0x308] sm:$0xff]  ;;  %v2404_v22 = vld [vmem:[%s2284_s17 + $0x80] sm:$0xff]  ;;  %v1843_v39 = vld [vmem:[%s2284_s17 + $0x58] sm:$0x3] }
  0x5d   : > { %932 = vmatpush.msra.mxu1 %v907_v52  ;;  %1244 = vmatpush.msrb.mxu3 %v1194_v1  ;;  %v1068_v50 = vld [vmem:[#allocation3 + $0x408] sm:$0xff]  ;;  %v872_v52 = vrot.slane %v1821_v43, 1  ;;  %v1822_v1 = vld [vmem:[%s2284_s17 + $0x50] sm:$0x1]  ;;  %v1524_v44 = vld [vmem:[#allocation3 + $0x6b8] sm:$0xff] }
  0x5e   : > { %777 = vmatpush.msrb.mxu0 %v732_v54  ;;  %1812 = vmatmul.msk.f32.vlgmr.msrb.gmra.mxu2 %vm308_vm1, %v2301_v4  ;;  %v598_v4 = vsel %vm583_vm2, %v596_v63, %v597_v0  ;;  %v1076_v54 = vld [vmem:[#allocation3 + $0x448] sm:$0xff]  ;;  %v1185_v63 = vld [vmem:[#allocation3 + $0x4f0] sm:$0xff]  ;;  %v1820_v0 = vld [vmem:[%s2284_s17 + $0x40] sm:$0xfe] }
  0x5f   : > { %1802 = vmatmul.msk.f32.gmra.mxu3 %vm308_vm1, %v601_v57  ;;  %933 = vmatpush.msra.mxu1 %v906_v58  ;;  %v1067_v57 = vld [vmem:[#allocation3 + $0x400] sm:$0xff]  ;;  %v1186_v58 = vld [vmem:[#allocation3 + $0x4f8] sm:$0xff]  ;;  %v874_v2 = vsel %vm419_vm0, %v872_v52, %v873_v53  ;;  %v1036_v52 = vrot.slane %v1843_v39, 2  ;;  %v1523_v53 = vld [vmem:[#allocation3 + $0x6b0] sm:$0xff] }
  0x60   : > { %778 = vmatpush.msrb.mxu0 %v731_v59  ;;  %1245 = vmatpush.msrb.mxu3 %v1193_v8  ;;  %v865_v59 = vsel %vm419_vm0, %v863_v45, %v864_v46  ;;  %v1839_v8 = vld [vmem:[%s2284_s17 + $0x38] sm:$0x3]  ;;  %v1360_v45 = vld [vmem:[#allocation3 + $0x5f0] sm:$0xff]  ;;  %v1180_v46 = vld [vmem:[#allocation3 + $0x4c8] sm:$0xff] }
  0x61   : > { %934 = vmatpush.msra.mxu1 %v905_v3  ;;  %1130 = vmatpush.msra.mxu2 %v1080_v9  ;;  %v1065_v3 = vld [vmem:[#allocation3 + $0x3f0] sm:$0xff]  ;;  %v869_v9 = vrot.slane %v1820_v0, 1 }
  0x62   : > { %779 = vmatpush.msrb.mxu0 %v730_v5  ;;  %1246 = vmatpush.msrb.mxu3 %v1192_v24  ;;  %v1825_v5 = vld [vmem:[%s2284_s17 + $0x68] sm:$0xfe]  ;;  %v1182_v24 = vld [vmem:[#allocation3 + $0x4d8] sm:$0xff]  ;;  %v1830_v0 = vld [vmem:[%s2284_s17 + $0x90] sm:$0x1] }
  0x63   : > { %935 = vmatpush.msra.mxu1 %v904_v10  ;;  %1131 = vmatpush.msra.mxu2 %v1079_v23  ;;  %v870_v10 = vrot.slane %v1822_v1, 1  ;;  %v878_v14 = vrot.slane %v1825_v5, 1  ;;  %v1840_v1 = vld [vmem:[%s2284_s17 + $0x40] sm:$0xfc]  ;;  %v1356_v39 = vld [vmem:[#allocation3 + $0x5d0] sm:$0xff] }
  0x64   : > { %780 = vmatpush.msrb.mxu0 %v729_v11  ;;  %671 = vmatmul.f32.gmra.mxu1 %v598_v4  ;;  %v1075_v11 = vld [vmem:[#allocation3 + $0x440] sm:$0xff]  ;;  %v1188_v4 = vld [vmem:[#allocation3 + $0x508] sm:$0xff] }
  0x65   : > { %781 = vmatmul.f32.vlgmr.msrb.gmra.mxu0 %v2319_v38  ;;  %936 = vmatpush.msra.mxu1 %v903_v12  ;;  %v866_v38 = vrot.slane %v1817_v19, 1  ;;  %v1184_v12 = vld [vmem:[#allocation3 + $0x4e8] sm:$0xff]  ;;  %v1361_v19 = vld [vmem:[#allocation3 + $0x5f8] sm:$0xff]  ;;  %v871_v23 = vsel %vm419_vm0, %v869_v9, %v870_v10 }
  0x66   : > { %1091 = vmatpush.msra.mxu0 %v1074_v13  ;;  %1813 = vmatmul.msk.f32.gmra.mxu2 %vm308_vm1, %v2314_v27  ;;  %v1064_v13 = vld [vmem:[#allocation3 + $0x3e8] sm:$0xff]  ;;  %v1847_v9 = vld [vmem:[%s2284_s17 + $0x78] sm:$0x3] }
  0x67   : > { %1803 = vmatmul.msk.f32.gmra.mxu3 %vm308_vm1, %v607_v16  ;;  %937 = vmatpush.msra.mxu1 %v902_v17  ;;  %v868_v41 = vsel %vm419_vm0, %v866_v38, %v867_v29  ;;  %v1029_v16 = vrot.slane %v1837_v7, 2  ;;  %v1030_v17 = vrot.slane %v1839_v8, 2  ;;  %v1826_v38 = vld [vmem:[%s2284_s17 + $0x70] sm:$0x1]  ;;  %v1836_v29 = vld [vmem:[%s2284_s17 + $0x20] sm:$0xfc] }
  0x68   : > { %1092 = vmatpush.msra.mxu0 %v1073_v18  ;;  %1132 = vmatpush.msra.mxu2 %v1078_v30  ;;  %v1187_v18 = vld [vmem:[#allocation3 + $0x500] sm:$0xff]  ;;  %v1838_v30 = vld [vmem:[%s2284_s17 + $0x30] sm:$0x3]  ;;  %v1845_v8 = vld [vmem:[%s2284_s17 + $0x68] sm:$0xfc] }
  0x69   : > { %938 = vmatpush.msra.mxu1 %v901_v25  ;;  %1247 = vmatpush.msrb.mxu3 %v1191_v31  ;;  %v1062_v25 = vld [vmem:[#allocation3 + $0x3d8] sm:$0xff]  ;;  %v880_v31 = vsel %vm419_vm0, %v878_v14, %v879_v15  ;;  %v1027_v43 = vrot.slane %v1838_v30, 2  ;;  %v1352_v7 = vld [vmem:[#allocation3 + $0x5b0] sm:$0xff]  ;;  %v1522_v14 = vld [vmem:[#allocation3 + $0x6a8] sm:$0xff] }
  0x6a   : > { %1093 = vmatpush.msra.mxu0 %v1072_v26  ;;  %1133 = vmatpush.msra.mxu2 %v1077_v47  ;;  %v1824_v26 = vld [vmem:[%s2284_s17 + $0x60] sm:$0xfe]  ;;  %v1060_v47 = vld [vmem:[#allocation3 + $0x3c8] sm:$0xff]  ;;  %v1846_v30 = vld [vmem:[%s2284_s17 + $0x70] sm:$0x3] }
  0x6b   : > { %939 = vmatpush.msra.mxu1 %v900_v32  ;;  %1248 = vmatpush.msrb.mxu3 %v1190_v48  ;;  %v1031_v32 = vsel %vm583_vm2, %v1029_v16, %v1030_v17  ;;  %v1176_v15 = vld [vmem:[#allocation3 + $0x4a8] sm:$0xff]  ;;  %v1041_v17 = vrot.slane %v1845_v8, 2 }
  0x6c   : > { %1094 = vmatpush.msra.mxu0 %v1071_v33  ;;  %674 = vmatmul.f32.gmra.mxu1 %v604_v34  ;;  %v1181_v33 = vld [vmem:[#allocation3 + $0x4d0] sm:$0xff]  ;;  %v1351_v16 = vld [vmem:[#allocation3 + $0x5a8] sm:$0xff] }
  0x6d   : > { %784 = vmatmul.f32.gmra.mxu0 %v2335_v62  ;;  %940 = vmatpush.msra.mxu1 %v899_v35  ;;  %v1061_v34 = vld [vmem:[#allocation3 + $0x3d0] sm:$0xff]  ;;  %v1829_v35 = vld [vmem:[%s2284_s17 + $0x88] sm:$0xfe] }
  0x6e   : > { %1095 = vmatpush.msra.mxu0 %v1070_v36  ;;  %1814 = vmatmul.msk.f32.gmra.mxu2 %vm308_vm1, %v2330_v51  ;;  %v1831_v36 = vld [vmem:[%s2284_s17 + $0x98] sm:$0x1]  ;;  %v884_v48 = vrot.slane %v1829_v35, 1 }
  0x6f   : > { %1832 = vmatmul.msk.f32.vlgmr.msra.gmra.mxu3 %vm308_vm1, %v868_v41  ;;  %941 = vmatpush.msra.mxu1 %v898_v40  ;;  %v875_v40 = vrot.slane %v1824_v26, 1  ;;  %v876_v41 = vrot.slane %v1826_v38, 1  ;;  %v1174_v26 = vld [vmem:[#allocation3 + $0x498] sm:$0xff] }
  0x70   : > { %1096 = vmatpush.msra.mxu0 %v1069_v42  ;;  %1134 = vmatpush.msra.mxu2 %v1076_v54  ;;  %v1026_v42 = vrot.slane %v1836_v29, 2  ;;  %v1359_v54 = vld [vmem:[#allocation3 + $0x5e8] sm:$0xff]  ;;  %v1349_v38 = vld [vmem:[#allocation3 + $0x598] sm:$0xff]  ;;  %v1844_v29 = vld [vmem:[%s2284_s17 + $0x60] sm:$0xfc] }
  0x71   : > { %942 = vmatpush.msra.mxu1 %v897_v49  ;;  %1249 = vmatpush.msrb.mxu3 %v1189_v55  ;;  %v885_v49 = vrot.slane %v1831_v36, 1  ;;  %v1179_v55 = vld [vmem:[#allocation3 + $0x4c0] sm:$0xff]  ;;  %v1851_v35 = vld [vmem:[%s2284_s17 + $0x98] sm:$0x3]  ;;  %v1038_v36 = vrot.slane %v1844_v29, 2 }
  0x72   : > { %1097 = vmatpush.msra.mxu0 %v1068_v50  ;;  %1135 = vmatpush.msra.mxu2 %v1075_v11  ;;  %v1035_v50 = vrot.slane %v1841_v37, 2  ;;  %v882_v11 = vrot.slane %v1830_v0, 1  ;;  %v1039_v37 = vrot.slane %v1846_v30, 2  ;;  %v1518_v0 = vld [vmem:[#allocation3 + $0x688] sm:$0xff]  ;;  %v1507_v30 = vld [vmem:[#allocation3 + $0x630] sm:$0xff] }
  0x73   : > { %943 = vmatpush.msra.mxu1 %v896_v56  ;;  %1250 = vmatpush.msrb.mxu3 %v1188_v4  ;;  %v1059_v56 = vld [vmem:[#allocation3 + $0x3c0] sm:$0xff]  ;;  %v1032_v4 = vrot.slane %v1840_v1, 2  ;;  %v1514_v1 = vld [vmem:[#allocation3 + $0x668] sm:$0xff] }
  0x74   : > { %1098 = vmatpush.msra.mxu0 %v1067_v57  ;;  %944 = vmatmul.f32.vlgmr.msra.gmra.mxu1 %v865_v59  ;;  %v877_v57 = vsel %vm419_vm0, %v875_v40, %v876_v41  ;;  %v1178_v59 = vld [vmem:[#allocation3 + $0x4b8] sm:$0xff]  ;;  %v1037_v5 = vsel %vm583_vm2, %v1035_v50, %v1036_v52  ;;  %v1172_v41 = vld [vmem:[#allocation3 + $0x488] sm:$0xff]  ;;  %v1848_v52 = vld [vmem:[%s2284_s17 + $0x80] sm:$0xfc] }
  0x75   : > { %787 = vmatmul.f32.gmra.mxu0 %v2349_v28  ;;  %1207 = vmatpush.msrb.mxu1 %v1186_v58  ;;  %v1028_v58 = vsel %vm583_vm2, %v1026_v42, %v1027_v43  ;;  %v1520_v40 = vld [vmem:[#allocation3 + $0x698] sm:$0xff]  ;;  %v1347_v42 = vld [vmem:[#allocation3 + $0x588] sm:$0xff] }
  0x76   : > { %1099 = vmatpush.msra.mxu0 %v1066_v60  ;;  %1815 = vmatmul.msk.f32.gmra.mxu2 %vm308_vm1, %v2390_v61  ;;  %v1353_v60 = vld [vmem:[#allocation3 + $0x5b8] sm:$0xff] }
  0x77   : > { %1833 = vmatmul.msk.f32.gmra.mxu3 %vm308_vm1, %v874_v2  ;;  %1208 = vmatpush.msrb.mxu1 %v1185_v63  ;;  %v1828_v63 = vld [vmem:[%s2284_s17 + $0x80] sm:$0xfe]  ;;  %v1842_v2 = vld [vmem:[%s2284_s17 + $0x50] sm:$0x3]  ;;  %v1345_v50 = vld [vmem:[#allocation3 + $0x578] sm:$0xff] }
  0x78   : > { %1100 = vmatpush.msra.mxu0 %v1065_v3  ;;  %1251 = vmatpush.msrb.mxu3 %v1187_v18  ;;  %v886_v3 = vsel %vm419_vm0, %v884_v48, %v885_v49  ;;  %v881_v10 = vrot.slane %v1828_v63, 1  ;;  %v1042_v18 = vrot.slane %v1847_v9, 2  ;;  %v1346_v48 = vld [vmem:[#allocation3 + $0x580] sm:$0xff]  ;;  %v1516_v49 = vld [vmem:[#allocation3 + $0x678] sm:$0xff] }
  0x79   : > { %1209 = vmatpush.msrb.mxu1 %v1184_v12  ;;  %1407 = vmatpush.msrb.mxu2 %v1361_v19  ;;  %v1033_v12 = vrot.slane %v1842_v2, 2  ;;  %v1357_v19 = vld [vmem:[#allocation3 + $0x5d8] sm:$0xff]  ;;  %v1354_v63 = vld [vmem:[#allocation3 + $0x5c0] sm:$0xff]  ;;  %v1343_v2 = vld [vmem:[#allocation3 + $0x568] sm:$0xff] }
  0x7a   : > { %1101 = vmatpush.msra.mxu0 %v1064_v13  ;;  %1570 = vmatpush.msra.mxu3 %v1524_v44  ;;  %v1358_v13 = vld [vmem:[#allocation3 + $0x5e0] sm:$0xff]  ;;  %v1048_v44 = vrot.slane %v1851_v35, 2  ;;  %v1341_v9 = vld [vmem:[#allocation3 + $0x558] sm:$0xff] }
  0x7b   : > { %1210 = vmatpush.msrb.mxu1 %v1183_v20  ;;  %1408 = vmatpush.msrb.mxu2 %v1360_v45  ;;  %v1521_v20 = vld [vmem:[#allocation3 + $0x6a0] sm:$0xff]  ;;  %v1355_v45 = vld [vmem:[#allocation3 + $0x5c8] sm:$0xff] }
  0x7c   : > { %1102 = vmatpush.msra.mxu0 %v1063_v21  ;;  %947 = vmatmul.f32.gmra.mxu1 %v871_v23  ;;  %v1175_v21 = vld [vmem:[#allocation3 + $0x4a0] sm:$0xff] }
  0x7d   : > { %790 = vmatmul.f32.gmra.mxu0 %v2404_v22  ;;  %1211 = vmatpush.msrb.mxu1 %v1182_v24  ;;  %v1350_v23 = vld [vmem:[#allocation3 + $0x5a0] sm:$0xff]  ;;  %v883_v24 = vsel %vm419_vm0, %v881_v10, %v882_v11  ;;  %v1870_v11 = vld [vmem:[%s2284_s17 + $0x50] sm:$0x1] }
  0x7e   : > { %1103 = vmatpush.msra.mxu0 %v1062_v25  ;;  %1852 = vmatmul.msk.f32.vlgmr.msra.gmra.mxu2 %vm308_vm1, %v1031_v32  ;;  %v1034_v25 = vsel %vm583_vm2, %v1032_v4, %v1033_v12  ;;  %v1173_v32 = vld [vmem:[#allocation3 + $0x490] sm:$0xff]  ;;  %v1868_v10 = vld [vmem:[%s2284_s17 + $0x40] sm:$0xfe] }
  0x7f   : > { %1834 = vmatmul.msk.f32.gmra.mxu3 %vm308_vm1, %v880_v31  ;;  %1212 = vmatpush.msrb.mxu1 %v1181_v33  ;;  %v1043_v31 = vsel %vm583_vm2, %v1041_v17, %v1042_v18  ;;  %v1348_v33 = vld [vmem:[#allocation3 + $0x590] sm:$0xff]  ;;  %v1306_v17 = vrot.slane %v1870_v11, 1  ;;  %v1510_v18 = vld [vmem:[#allocation3 + $0x648] sm:$0xff] }
  0x80   : > { %1104 = vmatpush.msra.mxu0 %v1061_v34  ;;  %1571 = vmatpush.msra.mxu3 %v1523_v53  ;;  %v1849_v34 = vld [vmem:[%s2284_s17 + $0x88] sm:$0xfc]  ;;  %v1850_v53 = vld [vmem:[%s2284_s17 + $0x90] sm:$0x3] }
  0x81   : > { %1213 = vmatpush.msrb.mxu1 %v1180_v46  ;;  %1409 = vmatpush.msrb.mxu2 %v1359_v54  ;;  %v1047_v43 = vrot.slane %v1849_v34, 2  ;;  %v1519_v46 = vld [vmem:[#allocation3 + $0x690] sm:$0xff]  ;;  %v1891_v34 = vld [vmem:[%s2284_s17 + $0x58] sm:$0x3] }
  0x82   : > { %1105 = vmatpush.msra.mxu0 %v1060_v47  ;;  %1572 = vmatpush.msra.mxu3 %v1522_v14  ;;  %v1171_v47 = vld [vmem:[#allocation3 + $0x480] sm:$0xff]  ;;  %v1511_v12 = vld [vmem:[#allocation3 + $0x650] sm:$0xff]  ;;  %v1873_v14 = vld [vmem:[%s2284_s17 + $0x68] sm:$0xfe] }
  0x83   : > { %1214 = vmatpush.msrb.mxu1 %v1179_v55  ;;  %1410 = vmatpush.msrb.mxu2 %v1358_v13  ;;  %v1049_v54 = vsel %vm583_vm2, %v1047_v43, %v1048_v44  ;;  %v1515_v55 = vld [vmem:[#allocation3 + $0x670] sm:$0xff]  ;;  %v1862_v43 = vld [vmem:[%s2284_s17 + $0xa0] sm:$0xff] }
  0x84   : > { %1106 = vmatpush.msra.mxu0 %v1059_v56  ;;  %950 = vmatmul.f32.gmra.mxu1 %v877_v57  ;;  %v1344_v56 = vld [vmem:[#allocation3 + $0x570] sm:$0xff]  ;;  %v1869_v57 = vld [vmem:[%s2284_s17 + $0x48] sm:$0xfe] }
  0x85   : > { %1107 = vmatmul.f32.vlgmr.msra.gmra.mxu0 %v1028_v58  ;;  %1215 = vmatpush.msrb.mxu1 %v1178_v59  ;;  %v1871_v58 = vld [vmem:[%s2284_s17 + $0x58] sm:$0x1]  ;;  %v1044_v59 = vrot.slane %v1848_v52, 2  ;;  %v1340_v13 = vld [vmem:[#allocation3 + $0x550] sm:$0xff] }
  0x86   : > { %1370 = vmatpush.msrb.mxu0 %v1353_v60  ;;  %1853 = vmatmul.msk.f32.gmra.mxu2 %vm308_vm1, %v1037_v5  ;;  %v1045_v60 = vrot.slane %v1850_v53, 2  ;;  %v1517_v5 = vld [vmem:[#allocation3 + $0x680] sm:$0xff]  ;;  %v1881_v53 = vld [vmem:[%s2284_s17 + $0xa8] sm:$0xfe]  ;;  %v1894_v11 = vld [vmem:[%s2284_s17 + $0x70] sm:$0x3] }
  0x87   : > { %1835 = vmatmul.msk.f32.gmra.mxu3 %vm308_vm1, %v886_v3  ;;  %1216 = vmatpush.msrb.mxu1 %v1177_v6  ;;  %v1309_v3 = vrot.slane %v1871_v58, 1  ;;  %v1513_v6 = vld [vmem:[#allocation3 + $0x660] sm:$0xff] }
  0x88   : > { %1371 = vmatpush.msrb.mxu0 %v1352_v7  ;;  %1411 = vmatpush.msrb.mxu2 %v1357_v19  ;;  %v1342_v7 = vld [vmem:[#allocation3 + $0x560] sm:$0xff]  ;;  %v1046_v8 = vsel %vm583_vm2, %v1044_v59, %v1045_v60  ;;  %v1339_v19 = vld [vmem:[#allocation3 + $0x548] sm:$0xff] }
  0x89   : > { %1217 = vmatpush.msrb.mxu1 %v1176_v15  ;;  %1573 = vmatpush.msra.mxu3 %v1521_v20  ;;  %v1875_v15 = vld [vmem:[%s2284_s17 + $0x78] sm:$0x1] }
  0x8a   : > { %1372 = vmatpush.msrb.mxu0 %v1351_v16  ;;  %1412 = vmatpush.msrb.mxu2 %v1356_v39  ;;  %v1305_v16 = vrot.slane %v1868_v10, 1  ;;  %v1315_v20 = vrot.slane %v1875_v15, 1  ;;  %v1892_v10 = vld [vmem:[%s2284_s17 + $0x60] sm:$0xfc] }
  0x8b   : > { %1218 = vmatpush.msrb.mxu1 %v1175_v21  ;;  %1574 = vmatpush.msra.mxu3 %v1520_v40  ;;  %v1509_v21 = vld [vmem:[#allocation3 + $0x640] sm:$0xff] }
  0x8c   : > { %1373 = vmatpush.msrb.mxu0 %v1350_v23  ;;  %953 = vmatmul.f32.gmra.mxu1 %v883_v24  ;;  %v1338_v23 = vld [vmem:[#allocation3 + $0x540] sm:$0xff]  ;;  %v1307_v24 = vsel %vm419_vm0, %v1305_v16, %v1306_v17  ;;  %v1474_v17 = vrot.slane %v1892_v10, 2 }
  0x8d   : > { %1110 = vmatmul.f32.gmra.mxu0 %v1034_v25  ;;  %1219 = vmatpush.msrb.mxu1 %v1174_v26  ;;  %v1872_v25 = vld [vmem:[%s2284_s17 + $0x60] sm:$0xfe]  ;;  %v1874_v26 = vld [vmem:[%s2284_s17 + $0x70] sm:$0x1] }
  0x8e   : > { %1374 = vmatpush.msrb.mxu0 %v1349_v38  ;;  %1854 = vmatmul.msk.f32.gmra.mxu2 %vm308_vm1, %v1043_v31  ;;  %v1863_v38 = vld [vmem:[%s2284_s17 + $0xa8] sm:$0xff]  ;;  %v1311_v35 = vrot.slane %v1872_v25, 1  ;;  %v1896_v25 = vld [vmem:[%s2284_s17 + $0x80] sm:$0xfc] }
  0x8f   : > { %1864 = vmatmul.msk.f32.vlgmr.msrb.gmra.mxu3 %vm308_vm1, %v2314_v27  ;;  %1220 = vmatpush.msrb.mxu1 %v1173_v32  ;;  %v1040_v27 = vsel %vm583_vm2, %v1038_v36, %v1039_v37  ;;  %v1877_v31 = vld [vmem:[%s2284_s17 + $0x88] sm:$0xfe]  ;;  %v1879_v32 = vld [vmem:[%s2284_s17 + $0x98] sm:$0x1]  ;;  %v1312_v36 = vrot.slane %v1874_v26, 1 }
  0x90   : > { %1375 = vmatpush.msrb.mxu0 %v1348_v33  ;;  %1413 = vmatpush.msrb.mxu2 %v1355_v45  ;;  %v1889_v33 = vld [vmem:[%s2284_s17 + $0x48] sm:$0xfc]  ;;  %v1320_v39 = vrot.slane %v1877_v31, 1  ;;  %v1504_v45 = vld [vmem:[#allocation3 + $0x618] sm:$0xff]  ;;  %v1898_v26 = vld [vmem:[%s2284_s17 + $0x90] sm:$0x3] }
  0x91   : > { %1221 = vmatpush.msrb.mxu1 %v1172_v41  ;;  %1575 = vmatpush.msra.mxu3 %v1519_v46  ;;  %v1506_v37 = vld [vmem:[#allocation3 + $0x628] sm:$0xff]  ;;  %v1471_v40 = vrot.slane %v1889_v33, 2  ;;  %v1472_v41 = vrot.slane %v1891_v34, 2  ;;  %v1313_v44 = vsel %vm419_vm0, %v1311_v35, %v1312_v36  ;;  %v1876_v46 = vld [vmem:[%s2284_s17 + $0x80] sm:$0xfe]  ;;  %v1481_v33 = vrot.slane %v1898_v26, 2 }
  0x92   : > { %1376 = vmatpush.msrb.mxu0 %v1347_v42  ;;  %1414 = vmatpush.msrb.mxu2 %v1354_v63  ;;  %v1505_v42 = vld [vmem:[#allocation3 + $0x620] sm:$0xff]  ;;  %v1502_v63 = vld [vmem:[#allocation3 + $0x608] sm:$0xff]  ;;  %v1903_v31 = vld [vmem:[%s2284_s17 + $0xb8] sm:$0x3] }
  0x93   : > { %1222 = vmatpush.msrb.mxu1 %v1171_v47  ;;  %1576 = vmatpush.msra.mxu3 %v1518_v0  ;;  %v1878_v47 = vld [vmem:[%s2284_s17 + $0x90] sm:$0x1]  ;;  %v1473_v52 = vsel %vm583_vm2, %v1471_v40, %v1472_v41  ;;  %v1490_v36 = vrot.slane %v1903_v31, 2  ;;  %v1628_v31 = vld [vmem:[%s2681_s3 + $0x68] sm:$0xff] }
  0x94   : > { %1377 = vmatpush.msrb.mxu0 %v1346_v48  ;;  %1223 = vmatmul.f32.vlgmr.msrb.gmra.mxu1 %v2335_v62  ;;  %v1308_v62 = vrot.slane %v1869_v57, 1  ;;  %v1888_v48 = vld [vmem:[%s2284_s17 + $0x40] sm:$0xfc]  ;;  %v1317_v57 = vrot.slane %v1876_v46, 1  ;;  %v1318_v58 = vrot.slane %v1878_v47, 1 }
  0x95   : > { %1113 = vmatmul.f32.gmra.mxu0 %v1040_v27  ;;  %1533 = vmatpush.msra.mxu1 %v1516_v49  ;;  %v1890_v27 = vld [vmem:[%s2284_s17 + $0x50] sm:$0x3]  ;;  %v1468_v59 = vrot.slane %v1888_v48, 2 }
  0x96   : > { %1378 = vmatpush.msrb.mxu0 %v1345_v50  ;;  %1855 = vmatmul.msk.f32.gmra.mxu2 %vm308_vm1, %v1049_v54  ;;  %v1310_v4 = vsel %vm419_vm0, %v1308_v62, %v1309_v3  ;;  %v1503_v50 = vld [vmem:[#allocation3 + $0x610] sm:$0xff]  ;;  %v1883_v54 = vld [vmem:[%s2284_s17 + $0xb8] sm:$0x1]  ;;  %v1469_v60 = vrot.slane %v1890_v27, 2 }
  0x97   : > { %1865 = vmatmul.msk.f32.gmra.mxu3 %vm308_vm1, %v2330_v51  ;;  %1534 = vmatpush.msra.mxu1 %v1515_v55  ;;  %v1512_v51 = vld [vmem:[#allocation3 + $0x658] sm:$0xff]  ;;  %v1893_v55 = vld [vmem:[%s2284_s17 + $0x68] sm:$0xfc] }
  0x98   : > { %1379 = vmatpush.msrb.mxu0 %v1344_v56  ;;  %1577 = vmatpush.msra.mxu3 %v1517_v5  ;;  %v1895_v56 = vld [vmem:[%s2284_s17 + $0x78] sm:$0x3]  ;;  %v1477_v62 = vrot.slane %v1893_v55, 2  ;;  %v1501_v5 = vld [vmem:[#allocation3 + $0x600] sm:$0xff] }
  0x99   : > { %1535 = vmatpush.msra.mxu1 %v1514_v1  ;;  %v1326_v1 = vrot.slane %v1881_v53, 1  ;;  %v1478_v3 = vrot.slane %v1895_v56, 2 }
  0x9a   : > { %1380 = vmatpush.msrb.mxu0 %v1343_v2  ;;  %v1327_v2 = vrot.slane %v1883_v54, 1 }
  0x9b   : > { %1536 = vmatpush.msra.mxu1 %v1513_v6 }
  0x9c   : > { %1381 = vmatpush.msrb.mxu0 %v1342_v7  ;;  %1226 = vmatmul.f32.gmra.mxu1 %v2349_v28  ;;  %v1314_v28 = vrot.slane %v1873_v14, 1  ;;  %v1319_v7 = vsel %vm419_vm0, %v1317_v57, %v1318_v58  ;;  %v1899_v14 = vld [vmem:[%s2284_s17 + $0x98] sm:$0x3] }
  0x9d   : > { %1116 = vmatmul.f32.gmra.mxu0 %v1046_v8  ;;  %1537 = vmatpush.msra.mxu1 %v1512_v51  ;;  %v1470_v8 = vsel %vm583_vm2, %v1468_v59, %v1469_v60  ;;  %v1880_v51 = vld [vmem:[%s2284_s17 + $0xa0] sm:$0xfe] }
  0x9e   : > { %1382 = vmatpush.msrb.mxu0 %v1341_v9  ;;  %1884 = vmatmul.msk.f32.vlgmr.msrb.gmra.mxu2 %vm308_vm1, %v1310_v4  ;;  %v1316_v29 = vsel %vm419_vm0, %v1314_v28, %v1315_v20  ;;  %v1882_v9 = vld [vmem:[%s2284_s17 + $0xb0] sm:$0x1]  ;;  %v1328_v4 = vsel %vm419_vm0, %v1326_v1, %v1327_v2  ;;  %v1323_v15 = vrot.slane %v1880_v51, 1  ;;  %v1484_v20 = vrot.slane %v1899_v14, 2 }
  0x9f   : > { %1866 = vmatmul.msk.f32.gmra.mxu3 %vm308_vm1, %v2390_v61  ;;  %1538 = vmatpush.msra.mxu1 %v1511_v12  ;;  %v1508_v61 = vld [vmem:[#allocation3 + $0x638] sm:$0xff]  ;;  %v1479_v12 = vsel %vm583_vm2, %v1477_v62, %v1478_v3  ;;  %v1324_v16 = vrot.slane %v1882_v9, 1 }
  0xa0   : > { %1383 = vmatpush.msrb.mxu0 %v1340_v13  ;;  %v1897_v13 = vld [vmem:[%s2284_s17 + $0x88] sm:$0xfc] }
  0xa1   : > { %1539 = vmatpush.msra.mxu1 %v1510_v18  ;;  %v1475_v18 = vrot.slane %v1894_v11, 2  ;;  %v1483_v28 = vrot.slane %v1897_v13, 2 }
  0xa2   : > { %1384 = vmatpush.msrb.mxu0 %v1339_v19 }
  0xa3   : > { %1540 = vmatpush.msra.mxu1 %v1509_v21 }
  0xa4   : > { %1385 = vmatpush.msrb.mxu0 %v1338_v23  ;;  %1229 = vmatmul.f32.gmra.mxu1 %v2404_v22  ;;  %v1321_v22 = vrot.slane %v1879_v32, 1  ;;  %v1325_v23 = vsel %vm419_vm0, %v1323_v15, %v1324_v16  ;;  %v1480_v32 = vrot.slane %v1896_v25, 2 }
  0xa5   : > { %1386 = vmatmul.f32.vlgmr.msrb.gmra.mxu0 %v1307_v24  ;;  %1541 = vmatpush.msra.mxu1 %v1508_v61  ;;  %v1476_v24 = vsel %vm583_vm2, %v1474_v17, %v1475_v18 }
  0xa6   : > { %1885 = vmatmul.msk.f32.gmra.mxu2 %vm308_vm1, %v1316_v29  ;;  %v1322_v49 = vsel %vm419_vm0, %v1320_v39, %v1321_v22  ;;  %v1485_v29 = vsel %vm583_vm2, %v1483_v28, %v1484_v20  ;;  %v1482_v22 = vsel %vm583_vm2, %v1480_v32, %v1481_v33 }
  0xa7   : > { %1867 = vmatmul.msk.f32.gmra.mxu3 %vm308_vm1, %v1863_v38  ;;  %1542 = vmatpush.msra.mxu1 %v1507_v30  ;;  %v1901_v30 = vld [vmem:[%s2284_s17 + $0xa8] sm:$0xfc] }
  0xa8   : > { %v1489_v35 = vrot.slane %v1901_v30, 2  ;;  %v1629_v30 = vld [vmem:[%s2681_s3 + $0x70] sm:$0xff] }
  0xa9   : > { %1543 = vmatpush.msra.mxu1 %v1506_v37 }
  0xab   : > { %1544 = vmatpush.msra.mxu1 %v1505_v42  ;;  %v1900_v42 = vld [vmem:[%s2284_s17 + $0xa0] sm:$0xfc] }
  0xac   : > { %1232 = vmatmul.f32.gmra.mxu1 %v1862_v43  ;;  %v1902_v43 = vld [vmem:[%s2284_s17 + $0xb0] sm:$0x3]  ;;  %v1486_v47 = vrot.slane %v1900_v42, 2  ;;  %v1623_v42 = vld [vmem:[%s2681_s3 + $0x40] sm:$0xff]  ;;  %s1790_s17 = sshll.u32 %s256_s15, 5 }
  0xad   : > { %1389 = vmatmul.f32.gmra.mxu0 %v1313_v44  ;;  %1545 = vmatpush.msra.mxu1 %v1504_v45  ;;  %v1491_v45 = vsel %vm583_vm2, %v1489_v35, %v1490_v36  ;;  %v1487_v48 = vrot.slane %v1902_v43, 2  ;;  %s258_s26 = scalar_lea.vmem [#allocation6], %s1790_s17  ;;  %s1669_s17 = scalar_lea.sflag [#allocation5], %s256_s15 }
  0xae   : > { %1886 = vmatmul.msk.f32.gmra.mxu2 %vm308_vm1, %v1322_v49  ;;  %s1683_s27 = sshll.u32 %s258_s26, 4  ;;  %s1684_s27 = int_to_ptr.vmem [resolvable:$true] %s1683_s27 }
  0xaf   : > { %1904 = vmatmul.msk.f32.vlgmr.msra.gmra.mxu3 %vm308_vm1, %v1473_v52  ;;  %1546 = vmatpush.msra.mxu1 %v1503_v50  ;;  %v367_v0 = vpop.f32.mrf.mxu1  ;;  %v1488_v52 = vsel %vm583_vm2, %v1486_v47, %v1487_v48  ;;  %v1620_v47 = vld [vmem:[%s2681_s3 + $0x28] sm:$0xff] }
  0xb1   : > { %1547 = vmatpush.msra.mxu1 %v1502_v63  ;;  %v531_v6 = vpop.f32.mrf.mxu3 }
  0xb3   : > { %1548 = vmatpush.msra.mxu1 %v1501_v5 }
  0xb4   : > { %1549 = vmatmul.f32.vlgmr.msra.gmra.mxu1 %v1470_v8 }
  0xb5   : > { %1392 = vmatmul.f32.gmra.mxu0 %v1319_v7 }
  0xb6   : > { %1887 = vmatmul.msk.f32.gmra.mxu2 %vm308_vm1, %v1328_v4 }
  0xb7   : > { %1905 = vmatmul.msk.f32.gmra.mxu3 %vm308_vm1, %v1479_v12  ;;  %v370_v19 = vpop.f32.mrf.mxu1 }
  0xb9   : > { %v534_v21 = vpop.f32.mrf.mxu3 }
  0xba   : > { %v338_v61 = vpop.f32.mrf.mxu0 }
  0xbb   : > { %v368_v38 = vadd.f32 %v367_v0, %v338_v61 }
  0xbc   : > { %1552 = vmatmul.f32.gmra.mxu1 %v1476_v24 }
  0xbd   : > { %1395 = vmatmul.f32.gmra.mxu0 %v1325_v23 }
  0xbf   : > { %1906 = vmatmul.msk.f32.gmra.mxu3 %vm308_vm1, %v1485_v29  ;;  %v373_v34 = vpop.f32.mrf.mxu1  ;;  %v1630_v29 = vld [vmem:[%s2681_s3 + $0x78] sm:$0xff] }
  0xc0   : > { %v502_v37 = vpop.f32.mrf.mxu2  ;;  %1635 = vmatpush.msra.mxu0 %v1630_v29  ;;  %1914 = vmatpush.msra.mxu2 %v1630_v29 }
  0xc1   : > { %v537_v39 = vpop.f32.mrf.mxu3  ;;  %v532_v40 = vadd.f32 %v531_v6, %v502_v37  ;;  %v1626_v37 = vld [vmem:[%s2681_s3 + $0x58] sm:$0xff] }
  0xc2   : > { %1636 = vmatpush.msra.mxu0 %v1629_v30  ;;  %1915 = vmatpush.msra.mxu2 %v1629_v30 }
  0xc3   : > { %v341_v41 = vpop.f32.mrf.mxu0  ;;  %v543_v46 = vadd.f32 %v532_v40, %v368_v38 }
  0xc4   : > { %v371_v44 = vadd.f32 %v370_v19, %v341_v41  ;;  %1555 = vmatmul.f32.gmra.mxu1 %v1482_v22  ;;  %1637 = vmatpush.msra.mxu0 %v1628_v31  ;;  %v1624_v22 = vld [vmem:[%s2681_s3 + $0x48] sm:$0xff] }
  0xc5   : > { %1916 = vmatpush.msra.mxu2 %v1628_v31 }
  0xc7   : > { %1907 = vmatmul.msk.f32.gmra.mxu3 %vm308_vm1, %v1491_v45  ;;  %v376_v27 = vpop.f32.mrf.mxu1  ;;  %v1622_v45 = vld [vmem:[%s2681_s3 + $0x38] sm:$0xff] }
  0xc9   : > { %v505_v49 = vpop.f32.mrf.mxu2 }
  0xca   : > { %v540_v50 = vpop.f32.mrf.mxu3  ;;  %v535_v53 = vadd.f32 %v534_v21, %v505_v49  ;;  %v1619_v49 = vld [vmem:[%s2681_s3 + $0x20] sm:$0xff] }
  0xcb   : > { %v344_v54 = vpop.f32.mrf.mxu0 }
  0xcc   : > { %v374_v55 = vadd.f32 %v373_v34, %v344_v54  ;;  %v544_v56 = vadd.f32 %v535_v53, %v371_v44  ;;  %1558 = vmatmul.f32.gmra.mxu1 %v1488_v52  ;;  %v1627_v34 = vld [vmem:[%s2681_s3 + $0x60] sm:$0xff]  ;;  %v1618_v53 = vld [vmem:[%s2681_s3 + $0x18] sm:$0xff]  ;;  %v1617_v54 = vld [vmem:[%s2681_s3 + $0x10] sm:$0xff] }
  0xcd   : > { %1638 = vmatpush.msra.mxu0 %v1627_v34  ;;  %1917 = vmatpush.msra.mxu2 %v1627_v34  ;;  %v2018_v34 = vld [vmem:[%s2680_s2] ss:$0 sm:$0xff] }
  0xcf   : > { %1639 = vmatpush.msra.mxu0 %v1626_v37  ;;  %1918 = vmatpush.msra.mxu2 %v1626_v37 }
  0xd1   : > { %v508_v57 = vpop.f32.mrf.mxu2  ;;  %v666_v58 = vpop.f32.mrf.mxu1 }
  0xd2   : > { %v538_v59 = vadd.f32 %v537_v39, %v508_v57  ;;  %v695_v60 = vpop.f32.mrf.mxu3  ;;  %v1625_v39 = vld [vmem:[%s2681_s3 + $0x50] sm:$0xff]  ;;  %v1615_v57 = vld [vmem:[%s2681_s3] sm:$0xff] }
  0xd3   : > { %v347_v63 = vpop.f32.mrf.mxu0  ;;  %v696_v0 = vadd.f32 %v695_v60, %v666_v58  ;;  %1640 = vmatpush.msra.mxu0 %v1625_v39  ;;  %1919 = vmatpush.msra.mxu2 %v1625_v39 }
  0xd4   : > { %v377_v1 = vadd.f32 %v376_v27, %v347_v63  ;;  %v545_v2 = vadd.f32 %v538_v59, %v374_v55  ;;  %v1616_v55 = vld [vmem:[%s2681_s3 + $0x8] sm:$0xff] }
  0xd5   : > { %v2514_v62 = vadd.f32 %v696_v0, %v543_v46  ;;  %1641 = vmatpush.msra.mxu0 %v1624_v22  ;;  %1920 = vmatpush.msra.mxu2 %v1624_v22  ;;  %v1621_v46 = vld [vmem:[%s2681_s3 + $0x30] sm:$0xff] }
  0xd7   : > { %1642 = vmatpush.msra.mxu0 %v1623_v42  ;;  %1921 = vmatpush.msra.mxu2 %v1623_v42 }
  0xd9   : > { %v511_v3 = vpop.f32.mrf.mxu2  ;;  %v669_v5 = vpop.f32.mrf.mxu1  ;;  %1643 = vmatpush.msra.mxu0 %v1622_v45  ;;  %1922 = vmatpush.msra.mxu2 %v1622_v45 }
  0xda   : > { %v541_v6 = vadd.f32 %v540_v50, %v511_v3  ;;  %v698_v7 = vpop.f32.mrf.mxu3 }
  0xdb   : > { %v699_v8 = vadd.f32 %v698_v7, %v669_v5  ;;  %1644 = vmatpush.msra.mxu0 %v1621_v46  ;;  %1923 = vmatpush.msra.mxu2 %v1621_v46 }
  0xdc   : > { %v546_v51 = vadd.f32 %v541_v6, %v377_v1 }
  0xdd   : > { %v2516_v9 = vadd.f32 %v699_v8, %v544_v56  ;;  %1645 = vmatpush.msra.mxu0 %v1620_v47  ;;  %1924 = vmatpush.msra.mxu2 %v1620_v47 }
  0xdf   : > { %1646 = vmatpush.msra.mxu0 %v1619_v49  ;;  %1925 = vmatpush.msra.mxu2 %v1619_v49 }
  0xe1   : > { %v672_v10 = vpop.f32.mrf.mxu1  ;;  %v2520_v12 = vpop.f32.mrf.mxu2  ;;  %1647 = vmatpush.msra.mxu0 %v1618_v53  ;;  %1926 = vmatpush.msra.mxu2 %v1618_v53 }
  0xe2   : > { %v2518_v11 = vpop.f32.mrf.mxu0  ;;  %v701_v4 = vpop.f32.mrf.mxu3 }
  0xe3   : > { %v702_v13 = vadd.f32 %v701_v4, %v672_v10  ;;  %1648 = vmatpush.msra.mxu0 %v1617_v54  ;;  %1927 = vmatpush.msra.mxu2 %v1617_v54  ;;  %v812_v3 = vadd.f32 %v2520_v12, %v2518_v11 }
  0xe5   : > { %v2522_v14 = vadd.f32 %v702_v13, %v545_v2  ;;  %1649 = vmatpush.msra.mxu0 %v1616_v55  ;;  %1928 = vmatpush.msra.mxu2 %v1616_v55  ;;  %v823_v8 = vadd.f32 %v812_v3, %v2514_v62 }
  0xe7   : > { %1650 = vmatpush.msra.mxu0 %v1615_v57  ;;  %1929 = vmatpush.msra.mxu2 %v1615_v57 }
  0xe9   : > { %v675_v15 = vpop.f32.mrf.mxu1  ;;  %v2526_v18 = vpop.f32.mrf.mxu2 }
  0xea   : > { %v2524_v16 = vpop.f32.mrf.mxu0  ;;  %v704_v17 = vpop.f32.mrf.mxu3 }
  0xeb   : > { %v705_v19 = vadd.f32 %v704_v17, %v675_v15  ;;  %v815_v13 = vadd.f32 %v2526_v18, %v2524_v16 }
  0xed   : > { %v2528_v28 = vadd.f32 %v705_v19, %v546_v51  ;;  %v824_v30 = vadd.f32 %v815_v13, %v2516_v9 }
  0xf1   : > { %v2532_v21 = vpop.f32.mrf.mxu1  ;;  %v2534_v23 = vpop.f32.mrf.mxu2 }
  0xf2   : > { %v2530_v20 = vpop.f32.mrf.mxu0  ;;  %v2536_v24 = vpop.f32.mrf.mxu3 }
  0xf3   : > { %v975_v5 = vadd.f32 %v2536_v24, %v2532_v21  ;;  %v818_v37 = vadd.f32 %v2534_v23, %v2530_v20 }
  0xf5   : > { %v986_v10 = vadd.f32 %v975_v5, %v823_v8  ;;  %v825_v47 = vadd.f32 %v818_v37, %v2522_v14 }
  0xf9   : > { %v2540_v25 = vpop.f32.mrf.mxu1  ;;  %v2542_v26 = vpop.f32.mrf.mxu2 }
  0xfa   : > { %v2538_v61 = vpop.f32.mrf.mxu0  ;;  %v2544_v38 = vpop.f32.mrf.mxu3 }
  0xfb   : > { %v978_v11 = vadd.f32 %v2544_v38, %v2540_v25  ;;  %v821_v54 = vadd.f32 %v2542_v26, %v2538_v61 }
  0xfd   : > { %v987_v16 = vadd.f32 %v978_v11, %v824_v30 }
 0x101   : > { %v2555_v32 = vpop.f32.mrf.mxu1  ;;  %v1137_v36 = vpop.f32.mrf.mxu2 }
 0x102   : > { %v2557_v33 = vpop.f32.mrf.mxu0  ;;  %v2562_v35 = vpop.f32.mrf.mxu3 }
 0x103   : > { %v1138_v51 = vadd.f32 %v1137_v36, %v2557_v33  ;;  %v981_v22 = vadd.f32 %v2562_v35, %v2555_v32 }
 0x105   : > { %v1149_v15 = vadd.f32 %v1138_v51, %v986_v10  ;;  %v988_v20 = vadd.f32 %v981_v22, %v825_v47 }
 0x109   : > { %v2573_v40 = vpop.f32.mrf.mxu1  ;;  %v1140_v44 = vpop.f32.mrf.mxu2 }
 0x10a   : > { %v1111_v41 = vpop.f32.mrf.mxu0  ;;  %v2578_v43 = vpop.f32.mrf.mxu3 }
 0x10b   : > { %v1141_v62 = vadd.f32 %v1140_v44, %v1111_v41 }
 0x10d   : > { %v1150_v39 = vadd.f32 %v1141_v62, %v987_v16 }
 0x111   : > { %v1224_v27 = vpop.f32.mrf.mxu1  ;;  %v1143_v50 = vpop.f32.mrf.mxu2 }
 0x112   : > { %v2589_v48 = vpop.f32.mrf.mxu0  ;;  %v1253_v52 = vpop.f32.mrf.mxu3 }
 0x113   : > { %v1254_v4 = vadd.f32 %v1253_v52, %v1224_v27  ;;  %v1144_v27 = vadd.f32 %v1143_v50, %v2589_v48  ;;  %v826_v48 = vadd.f32 %v821_v54, %v2528_v28 }
 0x115   : > { %v1265_v12 = vadd.f32 %v1254_v4, %v1149_v15  ;;  %v1151_v32 = vadd.f32 %v1144_v27, %v988_v20 }
 0x119   : > { %v1227_v56 = vpop.f32.mrf.mxu1  ;;  %v1146_v60 = vpop.f32.mrf.mxu2 }
 0x11a   : > { %v1256_v58 = vpop.f32.mrf.mxu3  ;;  %v1117_v59 = vpop.f32.mrf.mxu0 }
 0x11b   : > { %v1257_v18 = vadd.f32 %v1256_v58, %v1227_v56  ;;  %v984_v56 = vadd.f32 %v2578_v43, %v2573_v40  ;;  %v1147_v50 = vadd.f32 %v1146_v60, %v1117_v59 }
 0x11d   : > { %v1266_v9 = vadd.f32 %v1257_v18, %v1150_v39  ;;  %v989_v5 = vadd.f32 %v984_v56, %v826_v48 }
 0x11f   : > { %v1152_v8 = vadd.f32 %v1147_v50, %v989_v5 }
 0x121   : > { %v1230_v63 = vpop.f32.mrf.mxu1  ;;  %v1416_v2 = vpop.f32.mrf.mxu2 }
 0x122   : > { %v1259_v0 = vpop.f32.mrf.mxu3  ;;  %v1387_v1 = vpop.f32.mrf.mxu0 }
 0x123   : > { %v1417_v17 = vadd.f32 %v1416_v2, %v1387_v1  ;;  %v1260_v23 = vadd.f32 %v1259_v0, %v1230_v63 }
 0x125   : > { %v1428_v31 = vadd.f32 %v1417_v17, %v1265_v12  ;;  %v1267_v57 = vadd.f32 %v1260_v23, %v1151_v32 }
 0x129   : > { %v1233_v6 = vpop.f32.mrf.mxu1  ;;  %v1419_v29 = vpop.f32.mrf.mxu2 }
 0x12a   : > { %v1262_v7 = vpop.f32.mrf.mxu3  ;;  %v1390_v19 = vpop.f32.mrf.mxu0 }
 0x12b   : > { %v1420_v25 = vadd.f32 %v1419_v29, %v1390_v19  ;;  %v1263_v61 = vadd.f32 %v1262_v7, %v1233_v6  ;;  %v2019_v6 = vld [vmem:[%s2682_s4] ss:$0 sm:$0xff] }
 0x12d   : > { %v1429_v49 = vadd.f32 %v1420_v25, %v1266_v9  ;;  %v1268_v40 = vadd.f32 %v1263_v61, %v1152_v8 }
 0x131   : > { %v1550_v21 = vpop.f32.mrf.mxu1  ;;  %v1422_v45 = vpop.f32.mrf.mxu2 }
 0x132   : > { %v1579_v24 = vpop.f32.mrf.mxu3  ;;  %v1393_v41 = vpop.f32.mrf.mxu0 }
 0x133   : > { %v1580_v33 = vadd.f32 %v1579_v24, %v1550_v21  ;;  %v1423_v35 = vadd.f32 %v1422_v45, %v1393_v41 }
 0x135   : > { %v1591_v36 = vadd.f32 %v1580_v33, %v1428_v31  ;;  %v1430_v2 = vadd.f32 %v1423_v35, %v1267_v57 }
 0x137   : > { %v1607_v38 = vadd.f32 %v2018_v34, %v1591_v36 }
 0x139   : > { %v1611_v42 = vmax.f32 %v1607_v38, 0.0  ;;  %v1553_v44 = vpop.f32.mrf.mxu1  ;;  %v1425_v0 = vpop.f32.mrf.mxu2 }
 0x13a   : > { %v1582_v46 = vpop.f32.mrf.mxu3  ;;  %v1396_v63 = vpop.f32.mrf.mxu0 }
 0x13b   : > { %v1583_v52 = vadd.f32 %v1582_v46, %v1553_v44  ;;  %1651 = vmatmul.f32.vlgmr.msra.gmra.mxu0 %v1611_v42  ;;  %v1426_v51 = vadd.f32 %v1425_v0, %v1396_v63 }
 0x13d   : > { %v1592_v53 = vadd.f32 %v1583_v52, %v1429_v49  ;;  %v1431_v15 = vadd.f32 %v1426_v51, %v1268_v40 }
 0x13f   : > { %v1608_v55 = vadd.f32 %v2018_v34, %v1592_v53 }
 0x141   : > { %v1556_v58 = vpop.f32.mrf.mxu1  ;;  %v1612_v14 = vmax.f32 %v1608_v55, 0.0 }
 0x142   : > { %v1585_v1 = vpop.f32.mrf.mxu3 }
 0x143   : > { %v1586_v3 = vadd.f32 %v1585_v1, %v1556_v58  ;;  %1654 = vmatmul.f32.gmra.mxu0 %v1612_v14 }
 0x145   : > { %v1593_v26 = vadd.f32 %v1586_v3, %v1430_v2 }
 0x147   : > { %v1609_v10 = vadd.f32 %v2018_v34, %v1593_v26 }
 0x149   : > { %v1613_v43 = vmax.f32 %v1609_v10, 0.0  ;;  %v1559_v4 = vpop.f32.mrf.mxu1 }
 0x14a   : > { %v1588_v13 = vpop.f32.mrf.mxu3 }
 0x14b   : > { %v1589_v17 = vadd.f32 %v1588_v13, %v1559_v4  ;;  %1657 = vmatmul.f32.vlgmr.msra.gmra.mxu2 %v1613_v43 }
 0x14d   : > { %v1594_v28 = vadd.f32 %v1589_v17, %v1431_v15 }
 0x14f   : > { %v1610_v59 = vadd.f32 %v2018_v34, %v1594_v28 }
 0x151   : > { %v1614_v60 = vmax.f32 %v1610_v59, 0.0 }
 0x153   : > { %1660 = vmatmul.f32.gmra.mxu2 %v1614_v60 }
 0x1b8   : > { %v1652_v7 = vpop.f32.mrf.mxu0 }
 0x1b9   : > { %v1653_v19 = vadd.f32 %v2019_v6, %v1652_v7 }
 0x1bb   : > { %1664 = vst [vmem:[%s258_s26] sm:$0xff] %v1653_v19 }
 0x1c0   : > { %v1655_v29 = vpop.f32.mrf.mxu0 }
 0x1c1   : > { %v1656_v11 = vadd.f32 %v2019_v6, %v1655_v29 }
 0x1c3   : > { %1665 = vst [vmem:[%s258_s26 + $0x8] sm:$0xff] %v1656_v11 }
 0x1ce   : > { %v1658_v12 = vpop.f32.mrf.mxu2 }
 0x1cf   : > { %v1659_v21 = vadd.f32 %v2019_v6, %v1658_v12 }
 0x1d1   : > { %1666 = vst [vmem:[%s258_s26 + $0x10] sm:$0xff] %v1659_v21 }
 0x1d6   : > { %v1661_v24 = vpop.f32.mrf.mxu2 }
 0x1d7   : > { %v1662_v30 = vadd.f32 %v2019_v6, %v1661_v24 }
 0x1d9   : > { %1667 = vst [vmem:[%s258_s26 + $0x18] sm:$0xff] %v1662_v30 }
 0x1da   : > { %2077 = shalt.err (!%p2074_p11)
}
 0x1db   : > { %s2153_s15 = smov 128   ;;  %s2154_s26 = smov 8  }
 0x1dc   : > { %1936 = dma.vmem_to_hbm [thread:$0]  (%p2237_p3), %s1684_s27, 512, %s1686_s6, %s1669_s17, %s2153_s15, %s2153_s15, %s2154_s26  }
 0x1dd PF: > { %p1948_p12 = scmp.ge.s32.totalorder %s2148_s25, 2  ;;  %s1700_s12 = sand.u32 1, %s2120_s18  }
 0x1de   : > { %s1701_s14 = scalar_lea.sflag [#allocation5], %s1700_s12 }
 0x1df   : > { %p1943_p13 = pnand %p1948_p12, %p2246_p8 }
 0x1e1   : > { %p1944_p0 = pneg %p1943_p13 }
 0x1e3   : > { %2115 = dma.done.wait (%p1944_p0), %s1701_s14, 512  }
 0x1e4   : > { %2117 = vsyncadd (%p1944_p0), %s1701_s14, 4294966784  ;;  %s19_s25 = sadd.s32 1, %s2148_s25   ;;  %s2688_s18 = smov %s2124_s19 }
 0x1e5   : > { %p16_p1 = scmp.ge.s32.totalorder %s19_s25, 6   ;;  %s2689_s19 = smov %s2128_s20 }
 0x1e6   : > { %s2690_s20 = smov %s2267_s16  ;;  %s2691_s21 = smov %s2140_s23 }
 0x1e7   : > { %s2692_s22 = smov %s2144_s24  ;;  %s2693_s23 = smov %s2696_s28 }
 0x1e8   : > { %s2694_s24 = smov %s2700_s29  ;;  %18 = sbr.rel (!%p16_p1) target bundleno = 6 (0x6), region = 90 }
 0x1ed   :  { %1707 = vsyncpa [#allocation4], 1 }
 0x1ee   :  { %1709 = vsyncpa [#allocation4 + $0x1], 1 }
 0x1ef   :  { %1710 = vsyncpa [#allocation5], 1 }
 0x1f0   :  { %1712 = vsyncpa [#allocation5 + $0x1], 1 }

</bundles_post_ra>
